<compile_context>
chip_gen: v5e
topology: v5e:2x2
jax: 0.10.0
libtpu: 0.0.40
codegen_flags: <defaults>
</compile_context>

<pallas_src>
import functools
import math

import jax
import jax.numpy as jnp
from jax import lax
from jax.experimental import pallas as pl
from jax.experimental.pallas import tpu as pltpu

LN_EPS = 1e-5
VMEM_LIMIT_BYTES = 48 * 1024 * 1024   # fits v7x (64 MiB physical) and v5e/v6e (128 MiB)


# ----------------------------- helpers -----------------------------

def _div_tile(n, max_tile, quantum):
    """Largest tile <= max_tile that divides n and is a multiple of `quantum`
    (8 for sublane-dim tiles, 128 for lane-dim tiles). Falls back to the full
    dimension, which is always a legal block."""
    if n <= max_tile:
        return n
    t = (max_tile // quantum) * quantum
    while t >= quantum:
        if n % t == 0:
            return t
        t -= quantum
    return n


def _compiler_params(sem):
    return pltpu.CompilerParams(dimension_semantics=sem,
                                vmem_limit_bytes=VMEM_LIMIT_BYTES)


def _layernorm_f32(x, g, b):
    mean = jnp.mean(x, axis=-1, keepdims=True)
    var = jnp.mean(jnp.square(x - mean), axis=-1, keepdims=True)
    return (x - mean) * lax.rsqrt(var + LN_EPS) * g + b


# ----------------------------- fused matmul kernels -----------------------------

def _ln_matmul_kernel(x_ref, g_ref, b_ref, w_ref, o_ref):
    # Fused LayerNorm (f32 stats) + projection matmul.
    x = x_ref[...].astype(jnp.float32)
    n = _layernorm_f32(x, g_ref[...].astype(jnp.float32),
                       b_ref[...].astype(jnp.float32))
    o_ref[...] = jnp.dot(n.astype(w_ref.dtype), w_ref[...],
                         preferred_element_type=jnp.float32).astype(o_ref.dtype)


def _matmul_kernel(x_ref, w_ref, o_ref):
    o_ref[...] = jnp.dot(x_ref[...], w_ref[...],
                         preferred_element_type=jnp.float32).astype(o_ref.dtype)


def _matmul_bias_res_kernel(x_ref, w_ref, b_ref, r_ref, o_ref):
    # matmul + bias + residual fused in the epilogue (no extra HBM pass).
    acc = jnp.dot(x_ref[...], w_ref[...], preferred_element_type=jnp.float32)
    acc = acc + b_ref[...].astype(jnp.float32) + r_ref[...].astype(jnp.float32)
    o_ref[...] = acc.astype(o_ref.dtype)


def ln_linear(x2d, gamma, beta, w, *, tm_max=256, tn_max=512):
    M, K = x2d.shape
    N = w.shape[1]
    tm = _div_tile(M, tm_max, 8)
    tn = _div_tile(N, tn_max, 128)
    return pl.pallas_call(
        _ln_matmul_kernel,
        out_shape=jax.ShapeDtypeStruct((M, N), x2d.dtype),
        grid=(M // tm, N // tn),
        in_specs=[pl.BlockSpec((tm, K), lambda i, j: (i, 0)),
                  pl.BlockSpec((1, K), lambda i, j: (0, 0)),
                  pl.BlockSpec((1, K), lambda i, j: (0, 0)),
                  pl.BlockSpec((K, tn), lambda i, j: (0, j))],
        out_specs=pl.BlockSpec((tm, tn), lambda i, j: (i, j)),
        compiler_params=_compiler_params(("parallel", "parallel")),
    )(x2d, gamma, beta, w)


def linear(x2d, w, *, tm_max=256, tn_max=512):
    M, K = x2d.shape
    N = w.shape[1]
    tm = _div_tile(M, tm_max, 8)
    tn = _div_tile(N, tn_max, 128)
    return pl.pallas_call(
        _matmul_kernel,
        out_shape=jax.ShapeDtypeStruct((M, N), x2d.dtype),
        grid=(M // tm, N // tn),
        in_specs=[pl.BlockSpec((tm, K), lambda i, j: (i, 0)),
                  pl.BlockSpec((K, tn), lambda i, j: (0, j))],
        out_specs=pl.BlockSpec((tm, tn), lambda i, j: (i, j)),
        compiler_params=_compiler_params(("parallel", "parallel")),
    )(x2d, w)


def linear_bias_residual(x2d, w, b, residual, *, tm_max=256, tn_max=512):
    M, K = x2d.shape
    N = w.shape[1]
    tm = _div_tile(M, tm_max, 8)
    tn = _div_tile(N, tn_max, 128)
    return pl.pallas_call(
        _matmul_bias_res_kernel,
        out_shape=jax.ShapeDtypeStruct((M, N), residual.dtype),
        grid=(M // tm, N // tn),
        in_specs=[pl.BlockSpec((tm, K), lambda i, j: (i, 0)),
                  pl.BlockSpec((K, tn), lambda i, j: (0, j)),
                  pl.BlockSpec((1, tn), lambda i, j: (0, j)),
                  pl.BlockSpec((tm, tn), lambda i, j: (i, j))],
        out_specs=pl.BlockSpec((tm, tn), lambda i, j: (i, j)),
        compiler_params=_compiler_params(("parallel", "parallel")),
    )(x2d, w, b, residual)


# ----------------------------- attention kernel -----------------------------

def _mha_kernel(q_ref, k_ref, v_ref, o_ref, *, scale):
    # One batch element per grid step; all heads processed at once via
    # leading-batch einsums (no per-head grid steps, no explicit k.T).
    q = q_ref[0].astype(jnp.float32) * scale       # (H, Sq, Dh)
    k = k_ref[0].astype(jnp.float32)               # (H, Sk, Dh)
    v = v_ref[0].astype(jnp.float32)               # (H, Sk, Dh)
    s = jnp.einsum('hqd,hkd->hqk', q, k, preferred_element_type=jnp.float32)
    m = jnp.max(s, axis=-1, keepdims=True)
    p = jnp.exp(s - m)
    denom = jnp.sum(p, axis=-1, keepdims=True)
    p = p * pl.reciprocal(denom, approx=True)      # divide on the (idle) EUP slot
    o = jnp.einsum('hqk,hkd->hqd', p, v, preferred_element_type=jnp.float32)
    o_ref[0] = o.astype(o_ref.dtype)


def multihead_attention(q, k, v, n_heads, d_head):
    # q: (B, Sq, H*Dh), k/v: (B, Sk, H*Dh) -> (B, Sq, H*Dh)
    B, Sq, inner = q.shape
    Sk = k.shape[1]

    def to_heads(t, S):
        return t.reshape(B, S, n_heads, d_head).transpose(0, 2, 1, 3)  # (B,H,S,Dh)

    qh, kh, vh = to_heads(q, Sq), to_heads(k, Sk), to_heads(v, Sk)
    out = pl.pallas_call(
        functools.partial(_mha_kernel, scale=float(d_head) ** -0.5),
        out_shape=jax.ShapeDtypeStruct((B, n_heads, Sq, d_head), q.dtype),
        grid=(B,),
        in_specs=[pl.BlockSpec((1, n_heads, Sq, d_head), lambda b: (b, 0, 0, 0)),
                  pl.BlockSpec((1, n_heads, Sk, d_head), lambda b: (b, 0, 0, 0)),
                  pl.BlockSpec((1, n_heads, Sk, d_head), lambda b: (b, 0, 0, 0))],
        out_specs=pl.BlockSpec((1, n_heads, Sq, d_head), lambda b: (b, 0, 0, 0)),
        compiler_params=_compiler_params(("parallel",)),
    )(qh, kh, vh)
    # TODO(synk): folding heads into the lane dim inside the kernel would also remove
    # these two XLA transposes; kept host-side here for robust Mosaic lowering.
    return out.transpose(0, 2, 1, 3).reshape(B, Sq, inner)


# ----------------------------- fused GEGLU FeedForward -----------------------------

def _ffn_geglu_kernel(x_ref, g_ref, b_ref, wa_ref, ba_ref, wg_ref, bg_ref,
                      wo_ref, bo_ref, o_ref, acc_ref):
    # grid = (row tiles, ff-inner tiles); ff-inner is the reduction axis.
    j = pl.program_id(1)

    @pl.when(j == 0)
    def _():
        acc_ref[...] = jnp.zeros_like(acc_ref)

    x = x_ref[...].astype(jnp.float32)
    n = _layernorm_f32(x, g_ref[...].astype(jnp.float32),
                       b_ref[...].astype(jnp.float32)).astype(wa_ref.dtype)
    a = jnp.dot(n, wa_ref[...], preferred_element_type=jnp.float32) \
        + ba_ref[...].astype(jnp.float32)
    g = jnp.dot(n, wg_ref[...], preferred_element_type=jnp.float32) \
        + bg_ref[...].astype(jnp.float32)
    gelu_g = 0.5 * g * (1.0 + lax.erf(g * (1.0 / math.sqrt(2.0))))   # exact (erf) GELU
    h = (a * gelu_g).astype(wo_ref.dtype)                            # GEGLU gate
    acc_ref[...] += jnp.dot(h, wo_ref[...], preferred_element_type=jnp.float32)

    @pl.when(j == pl.num_programs(1) - 1)
    def _():
        # out bias + residual (is_res path: inner_dim == dim) fused in the epilogue.
        o_ref[...] = (acc_ref[...] + bo_ref[...].astype(jnp.float32) + x).astype(o_ref.dtype)


def ffn_geglu(x2d, gamma, beta, wa, ba, wg, bg, wo, bo, *, tm_max=256, tf_max=512):
    M, D = x2d.shape
    F = wa.shape[1]
    tm = _div_tile(M, tm_max, 8)
    tf = _div_tile(F, tf_max, 128)
    return pl.pallas_call(
        _ffn_geglu_kernel,
        out_shape=jax.ShapeDtypeStruct((M, D), x2d.dtype),
        grid=(M // tm, F // tf),
        in_specs=[pl.BlockSpec((tm, D), lambda i, j: (i, 0)),
                  pl.BlockSpec((1, D), lambda i, j: (0, 0)),
                  pl.BlockSpec((1, D), lambda i, j: (0, 0)),
                  pl.BlockSpec((D, tf), lambda i, j: (0, j)),
                  pl.BlockSpec((1, tf), lambda i, j: (0, j)),
                  pl.BlockSpec((D, tf), lambda i, j: (0, j)),
                  pl.BlockSpec((1, tf), lambda i, j: (0, j)),
                  pl.BlockSpec((tf, D), lambda i, j: (j, 0)),
                  pl.BlockSpec((1, D), lambda i, j: (0, 0))],
        out_specs=pl.BlockSpec((tm, D), lambda i, j: (i, 0)),
        scratch_shapes=[pltpu.VMEM((tm, D), jnp.float32)],
        compiler_params=_compiler_params(("parallel", "arbitrary")),
    )(x2d, gamma, beta, wa, ba, wg, bg, wo, bo)


# ----------------------------- parameters -----------------------------

def init_params(key, dim, n_heads, d_head, context_dim):
    inner = n_heads * d_head          # attention inner dim
    ff_inner = dim * 4                # FeedForward inner dim (mult=4)
    ks = jax.random.split(key, 16)
    s = 0.05

    def W(k, shape):
        return jax.random.normal(k, shape, jnp.float32) * s

    p = {
        'norm1_g': jnp.ones((1, dim), jnp.float32), 'norm1_b': jnp.zeros((1, dim), jnp.float32),
        'norm2_g': jnp.ones((1, dim), jnp.float32), 'norm2_b': jnp.zeros((1, dim), jnp.float32),
        'norm3_g': jnp.ones((1, dim), jnp.float32), 'norm3_b': jnp.zeros((1, dim), jnp.float32),
        # attn1 (self-attention): to_q/to_k/to_v bias-free (fused as one QKV matrix),
        # to_out has bias.
        'attn1_qkv_w': W(ks[0], (dim, 3 * inner)),
        'attn1_o_w': W(ks[1], (inner, dim)),
        'attn1_o_b': W(ks[2], (1, dim)),
        # attn2 (cross-attention): q from dim, k/v from context_dim (fused KV matrix).
        'attn2_q_w': W(ks[3], (dim, inner)),
        'attn2_kv_w': W(ks[4], (context_dim, 2 * inner)),
        'attn2_o_w': W(ks[5], (inner, dim)),
        'attn2_o_b': W(ks[6], (1, dim)),
        # FeedForward with GEGLU (gated_ff=True): proj split into value/gate halves.
        'ff_a_w': W(ks[7], (dim, ff_inner)),
        'ff_a_b': W(ks[8], (1, ff_inner)),
        'ff_g_w': W(ks[9], (dim, ff_inner)),
        'ff_g_b': W(ks[10], (1, ff_inner)),
        'ff_out_w': W(ks[11], (ff_inner, dim)),
        'ff_out_b': W(ks[12], (1, dim)),
    }
    return p


# ----------------------------- forward -----------------------------

def basic_transformer_block(x, context, params, n_heads, d_head):
    B, S, D = x.shape
    Bc, Sc, Dc = context.shape
    inner = n_heads * d_head
    xf = x.reshape(B * S, D)

    # --- attn1: self-attention on norm1(x), residual ---
    qkv = ln_linear(xf, params['norm1_g'], params['norm1_b'], params['attn1_qkv_w'])
    q = qkv[:, :inner]
    k = qkv[:, inner:2 * inner]
    v = qkv[:, 2 * inner:]
    a = multihead_attention(q.reshape(B, S, inner), k.reshape(B, S, inner),
                            v.reshape(B, S, inner), n_heads, d_head)
    xf = linear_bias_residual(a.reshape(B * S, inner),
                              params['attn1_o_w'], params['attn1_o_b'], xf)

    # --- attn2: cross-attention against context, residual ---
    q = ln_linear(xf, params['norm2_g'], params['norm2_b'], params['attn2_q_w'])
    kv = linear(context.reshape(Bc * Sc, Dc), params['attn2_kv_w'])
    k = kv[:, :inner]
    v = kv[:, inner:]
    a = multihead_attention(q.reshape(B, S, inner), k.reshape(Bc, Sc, inner),
                            v.reshape(Bc, Sc, inner), n_heads, d_head)
    xf = linear_bias_residual(a.reshape(B * S, inner),
                              params['attn2_o_w'], params['attn2_o_b'], xf)

    # --- FeedForward (GEGLU) on norm3(x), residual (is_res since inner_dim == dim) ---
    # Fully fused: LN + proj + GEGLU + out matmul + bias + residual in ONE kernel.
    xf = ffn_geglu(xf, params['norm3_g'], params['norm3_b'],
                   params['ff_a_w'], params['ff_a_b'],
                   params['ff_g_w'], params['ff_g_b'],
                   params['ff_out_w'], params['ff_out_b'])

    # TODO(synk): dropout layers are identity at inference (rate=0.0 here), so omitted.
    return xf.reshape(B, S, D)


# ----------------------------- main -----------------------------

if __name__ == "__main__":
    B, S, Sc = 2, 8, 12
    n_heads, d_head = 2, 16
    dim = n_heads * d_head            # 32 (inner_dim == dim -> is_res path)
    context_dim = 48

    key = jax.random.PRNGKey(0)
    kx, kc, kp = jax.random.split(key, 3)
    x = jax.random.normal(kx, (B, S, dim), jnp.float32)
    context = jax.random.normal(kc, (B, Sc, context_dim), jnp.float32)
    params = init_params(kp, dim, n_heads, d_head, context_dim)

    fwd = jax.jit(functools.partial(basic_transformer_block,
                                    n_heads=n_heads, d_head=d_head))
    out = fwd(x, context, params)
    out = jax.block_until_ready(out)
    assert out.shape == (B, S, dim) and out.dtype == jnp.float32
    print("KERNEL_OK")
</pallas_src>

<mosaic_0001>
module attributes {stable_mosaic.version = 11 : i64} {
  func.func @_matmul_kernel(%arg0: i32, %arg1: i32, %arg2: memref<24x48xf32, #tpu.memory_space<vmem>>, %arg3: memref<48x64xf32, #tpu.memory_space<vmem>>, %arg4: memref<24x64xf32, #tpu.memory_space<vmem>>) attributes {dimension_semantics = [#tpu.dimension_semantics<parallel>, #tpu.dimension_semantics<parallel>], iteration_bounds = array<i64: 1, 1>, scalar_prefetch = 0 : i64, scratch_operands = 0 : i64, tpu.core_type = #tpu.core_type<tc>, window_params = [{transform_indices = @transform_0, window_bounds = array<i64: 24, 48>}, {transform_indices = @transform_1, window_bounds = array<i64: 48, 64>}, {transform_indices = @transform_2, window_bounds = array<i64: 24, 64>}]} {
    %c0 = arith.constant 0 : index
    %c0_0 = arith.constant 0 : index
    %0 = vector.load %arg2[%c0, %c0_0] : memref<24x48xf32, #tpu.memory_space<vmem>>, vector<24x48xf32>
    %c0_1 = arith.constant 0 : index
    %c0_2 = arith.constant 0 : index
    %1 = vector.load %arg3[%c0_1, %c0_2] : memref<48x64xf32, #tpu.memory_space<vmem>>, vector<48x64xf32>
    %cst = arith.constant dense<0.000000e+00> : vector<24x64xf32>
    %2 = tpu.matmul %0, %1, %cst {dimension_numbers = #tpu.dot_dimension_numbers<[1], [0], [0], [1], [0, 0, 1, 1], [], []>} : vector<24x48xf32>, vector<48x64xf32>, vector<24x64xf32> -> vector<24x64xf32>
    %c0_3 = arith.constant 0 : index
    %c0_4 = arith.constant 0 : index
    %3 = vector.load %arg4[%c0_3, %c0_4] : memref<24x64xf32, #tpu.memory_space<vmem>>, vector<24x64xf32>
    tpu.vector_store %arg4[%c0_3, %c0_4], %2 {strides = array<i32>} : memref<24x64xf32, #tpu.memory_space<vmem>>, vector<24x64xf32>,
    return
  }
  func.func @transform_0(%arg0: i32, %arg1: i32) -> (i32, i32) {
    %c0_i32 = arith.constant 0 : i32
    %c0_i32_0 = arith.constant 0 : i32
    return %arg0, %c0_i32 : i32, i32
  }
  func.func @transform_1(%arg0: i32, %arg1: i32) -> (i32, i32) {
    %c0_i32 = arith.constant 0 : i32
    %c0_i32_0 = arith.constant 0 : i32
    return %c0_i32, %arg1 : i32, i32
  }
  func.func @transform_2(%arg0: i32, %arg1: i32) -> (i32, i32) {
    %c0_i32 = arith.constant 0 : i32
    return %arg0, %arg1 : i32, i32
  }
}

module attributes {stable_mosaic.version = 11 : i64} {
  func.func @_ln_matmul_kernel(%arg0: i32, %arg1: i32, %arg2: memref<16x32xf32, #tpu.memory_space<vmem>>, %arg3: memref<1x32xf32, #tpu.memory_space<vmem>>, %arg4: memref<1x32xf32, #tpu.memory_space<vmem>>, %arg5: memref<32x96xf32, #tpu.memory_space<vmem>>, %arg6: memref<16x96xf32, #tpu.memory_space<vmem>>) attributes {dimension_semantics = [#tpu.dimension_semantics<parallel>, #tpu.dimension_semantics<parallel>], iteration_bounds = array<i64: 1, 1>, scalar_prefetch = 0 : i64, scratch_operands = 0 : i64, tpu.core_type = #tpu.core_type<tc>, window_params = [{transform_indices = @transform_0, window_bounds = array<i64: 16, 32>}, {pipeline_mode = #tpu.pipeline_mode<synchronous>, transform_indices = @transform_1, window_bounds = array<i64: 1, 32>}, {pipeline_mode = #tpu.pipeline_mode<synchronous>, transform_indices = @transform_2, window_bounds = array<i64: 1, 32>}, {transform_indices = @transform_3, window_bounds = array<i64: 32, 96>}, {transform_indices = @transform_4, window_bounds = array<i64: 16, 96>}]} {
    %c0 = arith.constant 0 : index
    %c0_0 = arith.constant 0 : index
    %0 = vector.load %arg2[%c0, %c0_0] : memref<16x32xf32, #tpu.memory_space<vmem>>, vector<16x32xf32>
    %c0_1 = arith.constant 0 : index
    %c0_2 = arith.constant 0 : index
    %1 = vector.load %arg3[%c0_1, %c0_2] : memref<1x32xf32, #tpu.memory_space<vmem>>, vector<1x32xf32>
    %c0_3 = arith.constant 0 : index
    %c0_4 = arith.constant 0 : index
    %2 = vector.load %arg4[%c0_3, %c0_4] : memref<1x32xf32, #tpu.memory_space<vmem>>, vector<1x32xf32>
    %cst = arith.constant dense<0.000000e+00> : vector<16xf32>
    %3 = vector.multi_reduction <add>, %0, %cst [1] : vector<16x32xf32> to vector<16xf32>
    %4 = vector.shape_cast %3 : vector<16xf32> to vector<16x1xf32>
    %cst_5 = arith.constant 3.200000e+01 : f32
    %5 = vector.broadcast %cst_5 : f32 to vector<16x1xf32>
    %6 = arith.divf %4, %5 : vector<16x1xf32>
    %7 = vector.broadcast %6 : vector<16x1xf32> to vector<16x32xf32>
    %8 = arith.subf %0, %7 : vector<16x32xf32>
    %9 = arith.mulf %8, %8 : vector<16x32xf32>
    %cst_6 = arith.constant dense<0.000000e+00> : vector<16xf32>
    %10 = vector.multi_reduction <add>, %9, %cst_6 [1] : vector<16x32xf32> to vector<16xf32>
    %11 = vector.shape_cast %10 : vector<16xf32> to vector<16x1xf32>
    %cst_7 = arith.constant 3.200000e+01 : f32
    %12 = vector.broadcast %cst_7 : f32 to vector<16x1xf32>
    %13 = arith.divf %11, %12 : vector<16x1xf32>
    %14 = vector.broadcast %6 : vector<16x1xf32> to vector<16x32xf32>
    %15 = arith.subf %0, %14 : vector<16x32xf32>
    %cst_8 = arith.constant 9.99999974E-6 : f32
    %16 = vector.broadcast %cst_8 : f32 to vector<16x1xf32>
    %17 = arith.addf %13, %16 : vector<16x1xf32>
    %18 = math.rsqrt %17 : vector<16x1xf32>
    %19 = vector.broadcast %18 : vector<16x1xf32> to vector<16x32xf32>
    %20 = arith.mulf %15, %19 : vector<16x32xf32>
    %21 = vector.broadcast %1 : vector<1x32xf32> to vector<16x32xf32>
    %22 = arith.mulf %20, %21 : vector<16x32xf32>
    %23 = vector.broadcast %2 : vector<1x32xf32> to vector<16x32xf32>
    %24 = arith.addf %22, %23 : vector<16x32xf32>
    %c0_9 = arith.constant 0 : index
    %c0_10 = arith.constant 0 : index
    %25 = vector.load %arg5[%c0_9, %c0_10] : memref<32x96xf32, #tpu.memory_space<vmem>>, vector<32x96xf32>
    %cst_11 = arith.constant dense<0.000000e+00> : vector<16x96xf32>
    %26 = tpu.matmul %24, %25, %cst_11 {dimension_numbers = #tpu.dot_dimension_numbers<[1], [0], [0], [1], [0, 0, 1, 1], [], []>} : vector<16x32xf32>, vector<32x96xf32>, vector<16x96xf32> -> vector<16x96xf32>
    %c0_12 = arith.constant 0 : index
    %c0_13 = arith.constant 0 : index
    %27 = vector.load %arg6[%c0_12, %c0_13] : memref<16x96xf32, #tpu.memory_space<vmem>>, vector<16x96xf32>
    tpu.vector_store %arg6[%c0_12, %c0_13], %26 {strides = array<i32>} : memref<16x96xf32, #tpu.memory_space<vmem>>, vector<16x96xf32>,
    return
  }
  func.func @transform_0(%arg0: i32, %arg1: i32) -> (i32, i32) {
    %c0_i32 = arith.constant 0 : i32
    %c0_i32_0 = arith.constant 0 : i32
    return %arg0, %c0_i32 : i32, i32
  }
  func.func @transform_1(%arg0: i32, %arg1: i32) -> (i32, i32) {
    %c0_i32 = arith.constant 0 : i32
    %c0_i32_0 = arith.constant 0 : i32
    %c0_i32_1 = arith.constant 0 : i32
    return %c0_i32, %c0_i32_0 : i32, i32
  }
  func.func @transform_2(%arg0: i32, %arg1: i32) -> (i32, i32) {
    %c0_i32 = arith.constant 0 : i32
    %c0_i32_0 = arith.constant 0 : i32
    %c0_i32_1 = arith.constant 0 : i32
    return %c0_i32, %c0_i32_0 : i32, i32
  }
  func.func @transform_3(%arg0: i32, %arg1: i32) -> (i32, i32) {
    %c0_i32 = arith.constant 0 : i32
    %c0_i32_0 = arith.constant 0 : i32
    return %c0_i32, %arg1 : i32, i32
  }
  func.func @transform_4(%arg0: i32, %arg1: i32) -> (i32, i32) {
    %c0_i32 = arith.constant 0 : i32
    return %arg0, %arg1 : i32, i32
  }
}

module attributes {stable_mosaic.version = 11 : i64} {
  func.func @_mha_kernel(%arg0: i32, %arg1: memref<1x2x8x16xf32, #tpu.memory_space<vmem>>, %arg2: memref<1x2x8x16xf32, #tpu.memory_space<vmem>>, %arg3: memref<1x2x8x16xf32, #tpu.memory_space<vmem>>, %arg4: memref<1x2x8x16xf32, #tpu.memory_space<vmem>>) attributes {dimension_semantics = [#tpu.dimension_semantics<parallel>], iteration_bounds = array<i64: 2>, scalar_prefetch = 0 : i64, scratch_operands = 0 : i64, tpu.core_type = #tpu.core_type<tc>, window_params = [{transform_indices = @transform_0, window_bounds = array<i64: 1, 2, 8, 16>}, {transform_indices = @transform_1, window_bounds = array<i64: 1, 2, 8, 16>}, {transform_indices = @transform_2, window_bounds = array<i64: 1, 2, 8, 16>}, {transform_indices = @transform_3, window_bounds = array<i64: 1, 2, 8, 16>}]} {
    %c0 = arith.constant 0 : index
    %c0_0 = arith.constant 0 : index
    %c0_1 = arith.constant 0 : index
    %c0_2 = arith.constant 0 : index
    %0 = vector.load %arg1[%c0, %c0_0, %c0_1, %c0_2] : memref<1x2x8x16xf32, #tpu.memory_space<vmem>>, vector<1x2x8x16xf32>
    %1 = vector.shape_cast %0 : vector<1x2x8x16xf32> to vector<2x8x16xf32>
    %cst = arith.constant 2.500000e-01 : f32
    %2 = vector.broadcast %cst : f32 to vector<2x8x16xf32>
    %3 = arith.mulf %1, %2 : vector<2x8x16xf32>
    %c0_3 = arith.constant 0 : index
    %c0_4 = arith.constant 0 : index
    %c0_5 = arith.constant 0 : index
    %c0_6 = arith.constant 0 : index
    %4 = vector.load %arg2[%c0_3, %c0_4, %c0_5, %c0_6] : memref<1x2x8x16xf32, #tpu.memory_space<vmem>>, vector<1x2x8x16xf32>
    %5 = vector.shape_cast %4 : vector<1x2x8x16xf32> to vector<2x8x16xf32>
    %c0_7 = arith.constant 0 : index
    %c0_8 = arith.constant 0 : index
    %c0_9 = arith.constant 0 : index
    %c0_10 = arith.constant 0 : index
    %6 = vector.load %arg3[%c0_7, %c0_8, %c0_9, %c0_10] : memref<1x2x8x16xf32, #tpu.memory_space<vmem>>, vector<1x2x8x16xf32>
    %7 = vector.shape_cast %6 : vector<1x2x8x16xf32> to vector<2x8x16xf32>
    "tpu.trace_start"() <{level = 10 : i32, message = "hqd,hkd->hqk"}> : () -> ()
    %cst_11 = arith.constant dense<0.000000e+00> : vector<2x8x8xf32>
    %8 = tpu.matmul %3, %5, %cst_11 {dimension_numbers = #tpu.dot_dimension_numbers<[2], [2], [1], [1], [0, 0, 0, 1, 1, 1], [0], [0]>} : vector<2x8x16xf32>, vector<2x8x16xf32>, vector<2x8x8xf32> -> vector<2x8x8xf32>
    "tpu.trace_stop"() : () -> ()
    %cst_12 = arith.constant dense<0xFF800000> : vector<2x8xf32>
    %9 = vector.multi_reduction <maximumf>, %8, %cst_12 [2] : vector<2x8x8xf32> to vector<2x8xf32>
    %10 = vector.shape_cast %9 : vector<2x8xf32> to vector<2x8x1xf32>
    %11 = vector.broadcast %10 : vector<2x8x1xf32> to vector<2x8x8xf32>
    %12 = arith.subf %8, %11 : vector<2x8x8xf32>
    %13 = math.exp %12 : vector<2x8x8xf32>
    %cst_13 = arith.constant dense<0.000000e+00> : vector<2x8xf32>
    %14 = vector.multi_reduction <add>, %13, %cst_13 [2] : vector<2x8x8xf32> to vector<2x8xf32>
    %15 = vector.shape_cast %14 : vector<2x8xf32> to vector<2x8x1xf32>
    %16 = tpu.reciprocal %15 {approx = true} : vector<2x8x1xf32> -> vector<2x8x1xf32>
    %17 = vector.broadcast %16 : vector<2x8x1xf32> to vector<2x8x8xf32>
    %18 = arith.mulf %13, %17 : vector<2x8x8xf32>
    "tpu.trace_start"() <{level = 10 : i32, message = "hqk,hkd->hqd"}> : () -> ()
    %cst_14 = arith.constant dense<0.000000e+00> : vector<2x8x16xf32>
    %19 = tpu.matmul %18, %7, %cst_14 {dimension_numbers = #tpu.dot_dimension_numbers<[2], [1], [1], [2], [0, 0, 0, 1, 1, 2], [0], [0]>} : vector<2x8x8xf32>, vector<2x8x16xf32>, vector<2x8x16xf32> -> vector<2x8x16xf32>
    "tpu.trace_stop"() : () -> ()
    %c0_15 = arith.constant 0 : index
    %c0_16 = arith.constant 0 : index
    %c0_17 = arith.constant 0 : index
    %c0_18 = arith.constant 0 : index
    %20 = vector.load %arg4[%c0_15, %c0_16, %c0_17, %c0_18] : memref<1x2x8x16xf32, #tpu.memory_space<vmem>>, vector<1x2x8x16xf32>
    %21 = vector.shape_cast %20 : vector<1x2x8x16xf32> to vector<2x8x16xf32>
    %22 = vector.shape_cast %19 : vector<2x8x16xf32> to vector<1x2x8x16xf32>
    tpu.vector_store %arg4[%c0_15, %c0_16, %c0_17, %c0_18], %22 {strides = array<i32>} : memref<1x2x8x16xf32, #tpu.memory_space<vmem>>, vector<1x2x8x16xf32>,
    return
  }
  func.func @transform_0(%arg0: i32) -> (i32, i32, i32, i32) {
    %c0_i32 = arith.constant 0 : i32
    %c0_i32_0 = arith.constant 0 : i32
    %c0_i32_1 = arith.constant 0 : i32
    %c0_i32_2 = arith.constant 0 : i32
    return %arg0, %c0_i32, %c0_i32_0, %c0_i32_1 : i32, i32, i32, i32
  }
  func.func @transform_1(%arg0: i32) -> (i32, i32, i32, i32) {
    %c0_i32 = arith.constant 0 : i32
    %c0_i32_0 = arith.constant 0 : i32
    %c0_i32_1 = arith.constant 0 : i32
    %c0_i32_2 = arith.constant 0 : i32
    return %arg0, %c0_i32, %c0_i32_0, %c0_i32_1 : i32, i32, i32, i32
  }
  func.func @transform_2(%arg0: i32) -> (i32, i32, i32, i32) {
    %c0_i32 = arith.constant 0 : i32
    %c0_i32_0 = arith.constant 0 : i32
    %c0_i32_1 = arith.constant 0 : i32
    %c0_i32_2 = arith.constant 0 : i32
    return %arg0, %c0_i32, %c0_i32_0, %c0_i32_1 : i32, i32, i32, i32
  }
  func.func @transform_3(%arg0: i32) -> (i32, i32, i32, i32) {
    %c0_i32 = arith.constant 0 : i32
    %c0_i32_0 = arith.constant 0 : i32
    %c0_i32_1 = arith.constant 0 : i32
    %c0_i32_2 = arith.constant 0 : i32
    return %arg0, %c0_i32, %c0_i32_0, %c0_i32_1 : i32, i32, i32, i32
  }
}

module attributes {stable_mosaic.version = 11 : i64} {
  func.func @_matmul_bias_res_kernel(%arg0: i32, %arg1: i32, %arg2: memref<16x32xf32, #tpu.memory_space<vmem>>, %arg3: memref<32x32xf32, #tpu.memory_space<vmem>>, %arg4: memref<1x32xf32, #tpu.memory_space<vmem>>, %arg5: memref<16x32xf32, #tpu.memory_space<vmem>>, %arg6: memref<16x32xf32, #tpu.memory_space<vmem>>) attributes {dimension_semantics = [#tpu.dimension_semantics<parallel>, #tpu.dimension_semantics<parallel>], iteration_bounds = array<i64: 1, 1>, scalar_prefetch = 0 : i64, scratch_operands = 0 : i64, tpu.core_type = #tpu.core_type<tc>, window_params = [{transform_indices = @transform_0, window_bounds = array<i64: 16, 32>}, {transform_indices = @transform_1, window_bounds = array<i64: 32, 32>}, {transform_indices = @transform_2, window_bounds = array<i64: 1, 32>}, {transform_indices = @transform_3, window_bounds = array<i64: 16, 32>}, {transform_indices = @transform_4, window_bounds = array<i64: 16, 32>}]} {
    %c0 = arith.constant 0 : index
    %c0_0 = arith.constant 0 : index
    %0 = vector.load %arg2[%c0, %c0_0] : memref<16x32xf32, #tpu.memory_space<vmem>>, vector<16x32xf32>
    %c0_1 = arith.constant 0 : index
    %c0_2 = arith.constant 0 : index
    %1 = vector.load %arg3[%c0_1, %c0_2] : memref<32x32xf32, #tpu.memory_space<vmem>>, vector<32x32xf32>
    %cst = arith.constant dense<0.000000e+00> : vector<16x32xf32>
    %2 = tpu.matmul %0, %1, %cst {dimension_numbers = #tpu.dot_dimension_numbers<[1], [0], [0], [1], [0, 0, 1, 1], [], []>} : vector<16x32xf32>, vector<32x32xf32>, vector<16x32xf32> -> vector<16x32xf32>
    %c0_3 = arith.constant 0 : index
    %c0_4 = arith.constant 0 : index
    %3 = vector.load %arg4[%c0_3, %c0_4] : memref<1x32xf32, #tpu.memory_space<vmem>>, vector<1x32xf32>
    %4 = vector.broadcast %3 : vector<1x32xf32> to vector<16x32xf32>
    %5 = arith.addf %2, %4 : vector<16x32xf32>
    %c0_5 = arith.constant 0 : index
    %c0_6 = arith.constant 0 : index
    %6 = vector.load %arg5[%c0_5, %c0_6] : memref<16x32xf32, #tpu.memory_space<vmem>>, vector<16x32xf32>
    %7 = arith.addf %5, %6 : vector<16x32xf32>
    %c0_7 = arith.constant 0 : index
    %c0_8 = arith.constant 0 : index
    %8 = vector.load %arg6[%c0_7, %c0_8] : memref<16x32xf32, #tpu.memory_space<vmem>>, vector<16x32xf32>
    tpu.vector_store %arg6[%c0_7, %c0_8], %7 {strides = array<i32>} : memref<16x32xf32, #tpu.memory_space<vmem>>, vector<16x32xf32>,
    return
  }
  func.func @transform_0(%arg0: i32, %arg1: i32) -> (i32, i32) {
    %c0_i32 = arith.constant 0 : i32
    %c0_i32_0 = arith.constant 0 : i32
    return %arg0, %c0_i32 : i32, i32
  }
  func.func @transform_1(%arg0: i32, %arg1: i32) -> (i32, i32) {
    %c0_i32 = arith.constant 0 : i32
    %c0_i32_0 = arith.constant 0 : i32
    return %c0_i32, %arg1 : i32, i32
  }
  func.func @transform_2(%arg0: i32, %arg1: i32) -> (i32, i32) {
    %c0_i32 = arith.constant 0 : i32
    %c0_i32_0 = arith.constant 0 : i32
    return %c0_i32, %arg1 : i32, i32
  }
  func.func @transform_3(%arg0: i32, %arg1: i32) -> (i32, i32) {
    %c0_i32 = arith.constant 0 : i32
    return %arg0, %arg1 : i32, i32
  }
  func.func @transform_4(%arg0: i32, %arg1: i32) -> (i32, i32) {
    %c0_i32 = arith.constant 0 : i32
    return %arg0, %arg1 : i32, i32
  }
}

module attributes {stable_mosaic.version = 11 : i64} {
  func.func @_ln_matmul_kernel(%arg0: i32, %arg1: i32, %arg2: memref<16x32xf32, #tpu.memory_space<vmem>>, %arg3: memref<1x32xf32, #tpu.memory_space<vmem>>, %arg4: memref<1x32xf32, #tpu.memory_space<vmem>>, %arg5: memref<32x32xf32, #tpu.memory_space<vmem>>, %arg6: memref<16x32xf32, #tpu.memory_space<vmem>>) attributes {dimension_semantics = [#tpu.dimension_semantics<parallel>, #tpu.dimension_semantics<parallel>], iteration_bounds = array<i64: 1, 1>, scalar_prefetch = 0 : i64, scratch_operands = 0 : i64, tpu.core_type = #tpu.core_type<tc>, window_params = [{transform_indices = @transform_0, window_bounds = array<i64: 16, 32>}, {pipeline_mode = #tpu.pipeline_mode<synchronous>, transform_indices = @transform_1, window_bounds = array<i64: 1, 32>}, {pipeline_mode = #tpu.pipeline_mode<synchronous>, transform_indices = @transform_2, window_bounds = array<i64: 1, 32>}, {transform_indices = @transform_3, window_bounds = array<i64: 32, 32>}, {transform_indices = @transform_4, window_bounds = array<i64: 16, 32>}]} {
    %c0 = arith.constant 0 : index
    %c0_0 = arith.constant 0 : index
    %0 = vector.load %arg2[%c0, %c0_0] : memref<16x32xf32, #tpu.memory_space<vmem>>, vector<16x32xf32>
    %c0_1 = arith.constant 0 : index
    %c0_2 = arith.constant 0 : index
    %1 = vector.load %arg3[%c0_1, %c0_2] : memref<1x32xf32, #tpu.memory_space<vmem>>, vector<1x32xf32>
    %c0_3 = arith.constant 0 : index
    %c0_4 = arith.constant 0 : index
    %2 = vector.load %arg4[%c0_3, %c0_4] : memref<1x32xf32, #tpu.memory_space<vmem>>, vector<1x32xf32>
    %cst = arith.constant dense<0.000000e+00> : vector<16xf32>
    %3 = vector.multi_reduction <add>, %0, %cst [1] : vector<16x32xf32> to vector<16xf32>
    %4 = vector.shape_cast %3 : vector<16xf32> to vector<16x1xf32>
    %cst_5 = arith.constant 3.200000e+01 : f32
    %5 = vector.broadcast %cst_5 : f32 to vector<16x1xf32>
    %6 = arith.divf %4, %5 : vector<16x1xf32>
    %7 = vector.broadcast %6 : vector<16x1xf32> to vector<16x32xf32>
    %8 = arith.subf %0, %7 : vector<16x32xf32>
    %9 = arith.mulf %8, %8 : vector<16x32xf32>
    %cst_6 = arith.constant dense<0.000000e+00> : vector<16xf32>
    %10 = vector.multi_reduction <add>, %9, %cst_6 [1] : vector<16x32xf32> to vector<16xf32>
    %11 = vector.shape_cast %10 : vector<16xf32> to vector<16x1xf32>
    %cst_7 = arith.constant 3.200000e+01 : f32
    %12 = vector.broadcast %cst_7 : f32 to vector<16x1xf32>
    %13 = arith.divf %11, %12 : vector<16x1xf32>
    %14 = vector.broadcast %6 : vector<16x1xf32> to vector<16x32xf32>
    %15 = arith.subf %0, %14 : vector<16x32xf32>
    %cst_8 = arith.constant 9.99999974E-6 : f32
    %16 = vector.broadcast %cst_8 : f32 to vector<16x1xf32>
    %17 = arith.addf %13, %16 : vector<16x1xf32>
    %18 = math.rsqrt %17 : vector<16x1xf32>
    %19 = vector.broadcast %18 : vector<16x1xf32> to vector<16x32xf32>
    %20 = arith.mulf %15, %19 : vector<16x32xf32>
    %21 = vector.broadcast %1 : vector<1x32xf32> to vector<16x32xf32>
    %22 = arith.mulf %20, %21 : vector<16x32xf32>
    %23 = vector.broadcast %2 : vector<1x32xf32> to vector<16x32xf32>
    %24 = arith.addf %22, %23 : vector<16x32xf32>
    %c0_9 = arith.constant 0 : index
    %c0_10 = arith.constant 0 : index
    %25 = vector.load %arg5[%c0_9, %c0_10] : memref<32x32xf32, #tpu.memory_space<vmem>>, vector<32x32xf32>
    %cst_11 = arith.constant dense<0.000000e+00> : vector<16x32xf32>
    %26 = tpu.matmul %24, %25, %cst_11 {dimension_numbers = #tpu.dot_dimension_numbers<[1], [0], [0], [1], [0, 0, 1, 1], [], []>} : vector<16x32xf32>, vector<32x32xf32>, vector<16x32xf32> -> vector<16x32xf32>
    %c0_12 = arith.constant 0 : index
    %c0_13 = arith.constant 0 : index
    %27 = vector.load %arg6[%c0_12, %c0_13] : memref<16x32xf32, #tpu.memory_space<vmem>>, vector<16x32xf32>
    tpu.vector_store %arg6[%c0_12, %c0_13], %26 {strides = array<i32>} : memref<16x32xf32, #tpu.memory_space<vmem>>, vector<16x32xf32>,
    return
  }
  func.func @transform_0(%arg0: i32, %arg1: i32) -> (i32, i32) {
    %c0_i32 = arith.constant 0 : i32
    %c0_i32_0 = arith.constant 0 : i32
    return %arg0, %c0_i32 : i32, i32
  }
  func.func @transform_1(%arg0: i32, %arg1: i32) -> (i32, i32) {
    %c0_i32 = arith.constant 0 : i32
    %c0_i32_0 = arith.constant 0 : i32
    %c0_i32_1 = arith.constant 0 : i32
    return %c0_i32, %c0_i32_0 : i32, i32
  }
  func.func @transform_2(%arg0: i32, %arg1: i32) -> (i32, i32) {
    %c0_i32 = arith.constant 0 : i32
    %c0_i32_0 = arith.constant 0 : i32
    %c0_i32_1 = arith.constant 0 : i32
    return %c0_i32, %c0_i32_0 : i32, i32
  }
  func.func @transform_3(%arg0: i32, %arg1: i32) -> (i32, i32) {
    %c0_i32 = arith.constant 0 : i32
    %c0_i32_0 = arith.constant 0 : i32
    return %c0_i32, %arg1 : i32, i32
  }
  func.func @transform_4(%arg0: i32, %arg1: i32) -> (i32, i32) {
    %c0_i32 = arith.constant 0 : i32
    return %arg0, %arg1 : i32, i32
  }
}

module attributes {stable_mosaic.version = 11 : i64} {
  func.func @_mha_kernel(%arg0: i32, %arg1: memref<1x2x8x16xf32, #tpu.memory_space<vmem>>, %arg2: memref<1x2x12x16xf32, #tpu.memory_space<vmem>>, %arg3: memref<1x2x12x16xf32, #tpu.memory_space<vmem>>, %arg4: memref<1x2x8x16xf32, #tpu.memory_space<vmem>>) attributes {dimension_semantics = [#tpu.dimension_semantics<parallel>], iteration_bounds = array<i64: 2>, scalar_prefetch = 0 : i64, scratch_operands = 0 : i64, tpu.core_type = #tpu.core_type<tc>, window_params = [{transform_indices = @transform_0, window_bounds = array<i64: 1, 2, 8, 16>}, {transform_indices = @transform_1, window_bounds = array<i64: 1, 2, 12, 16>}, {transform_indices = @transform_2, window_bounds = array<i64: 1, 2, 12, 16>}, {transform_indices = @transform_3, window_bounds = array<i64: 1, 2, 8, 16>}]} {
    %c0 = arith.constant 0 : index
    %c0_0 = arith.constant 0 : index
    %c0_1 = arith.constant 0 : index
    %c0_2 = arith.constant 0 : index
    %0 = vector.load %arg1[%c0, %c0_0, %c0_1, %c0_2] : memref<1x2x8x16xf32, #tpu.memory_space<vmem>>, vector<1x2x8x16xf32>
    %1 = vector.shape_cast %0 : vector<1x2x8x16xf32> to vector<2x8x16xf32>
    %cst = arith.constant 2.500000e-01 : f32
    %2 = vector.broadcast %cst : f32 to vector<2x8x16xf32>
    %3 = arith.mulf %1, %2 : vector<2x8x16xf32>
    %c0_3 = arith.constant 0 : index
    %c0_4 = arith.constant 0 : index
    %c0_5 = arith.constant 0 : index
    %c0_6 = arith.constant 0 : index
    %4 = vector.load %arg2[%c0_3, %c0_4, %c0_5, %c0_6] : memref<1x2x12x16xf32, #tpu.memory_space<vmem>>, vector<1x2x12x16xf32>
    %5 = vector.shape_cast %4 : vector<1x2x12x16xf32> to vector<2x12x16xf32>
    %c0_7 = arith.constant 0 : index
    %c0_8 = arith.constant 0 : index
    %c0_9 = arith.constant 0 : index
    %c0_10 = arith.constant 0 : index
    %6 = vector.load %arg3[%c0_7, %c0_8, %c0_9, %c0_10] : memref<1x2x12x16xf32, #tpu.memory_space<vmem>>, vector<1x2x12x16xf32>
    %7 = vector.shape_cast %6 : vector<1x2x12x16xf32> to vector<2x12x16xf32>
    "tpu.trace_start"() <{level = 10 : i32, message = "hqd,hkd->hqk"}> : () -> ()
    %cst_11 = arith.constant dense<0.000000e+00> : vector<2x8x12xf32>
    %8 = tpu.matmul %3, %5, %cst_11 {dimension_numbers = #tpu.dot_dimension_numbers<[2], [2], [1], [1], [0, 0, 0, 1, 1, 1], [0], [0]>} : vector<2x8x16xf32>, vector<2x12x16xf32>, vector<2x8x12xf32> -> vector<2x8x12xf32>
    "tpu.trace_stop"() : () -> ()
    %cst_12 = arith.constant dense<0xFF800000> : vector<2x8xf32>
    %9 = vector.multi_reduction <maximumf>, %8, %cst_12 [2] : vector<2x8x12xf32> to vector<2x8xf32>
    %10 = vector.shape_cast %9 : vector<2x8xf32> to vector<2x8x1xf32>
    %11 = vector.broadcast %10 : vector<2x8x1xf32> to vector<2x8x12xf32>
    %12 = arith.subf %8, %11 : vector<2x8x12xf32>
    %13 = math.exp %12 : vector<2x8x12xf32>
    %cst_13 = arith.constant dense<0.000000e+00> : vector<2x8xf32>
    %14 = vector.multi_reduction <add>, %13, %cst_13 [2] : vector<2x8x12xf32> to vector<2x8xf32>
    %15 = vector.shape_cast %14 : vector<2x8xf32> to vector<2x8x1xf32>
    %16 = tpu.reciprocal %15 {approx = true} : vector<2x8x1xf32> -> vector<2x8x1xf32>
    %17 = vector.broadcast %16 : vector<2x8x1xf32> to vector<2x8x12xf32>
    %18 = arith.mulf %13, %17 : vector<2x8x12xf32>
    "tpu.trace_start"() <{level = 10 : i32, message = "hqk,hkd->hqd"}> : () -> ()
    %cst_14 = arith.constant dense<0.000000e+00> : vector<2x8x16xf32>
    %19 = tpu.matmul %18, %7, %cst_14 {dimension_numbers = #tpu.dot_dimension_numbers<[2], [1], [1], [2], [0, 0, 0, 1, 1, 2], [0], [0]>} : vector<2x8x12xf32>, vector<2x12x16xf32>, vector<2x8x16xf32> -> vector<2x8x16xf32>
    "tpu.trace_stop"() : () -> ()
    %c0_15 = arith.constant 0 : index
    %c0_16 = arith.constant 0 : index
    %c0_17 = arith.constant 0 : index
    %c0_18 = arith.constant 0 : index
    %20 = vector.load %arg4[%c0_15, %c0_16, %c0_17, %c0_18] : memref<1x2x8x16xf32, #tpu.memory_space<vmem>>, vector<1x2x8x16xf32>
    %21 = vector.shape_cast %20 : vector<1x2x8x16xf32> to vector<2x8x16xf32>
    %22 = vector.shape_cast %19 : vector<2x8x16xf32> to vector<1x2x8x16xf32>
    tpu.vector_store %arg4[%c0_15, %c0_16, %c0_17, %c0_18], %22 {strides = array<i32>} : memref<1x2x8x16xf32, #tpu.memory_space<vmem>>, vector<1x2x8x16xf32>,
    return
  }
  func.func @transform_0(%arg0: i32) -> (i32, i32, i32, i32) {
    %c0_i32 = arith.constant 0 : i32
    %c0_i32_0 = arith.constant 0 : i32
    %c0_i32_1 = arith.constant 0 : i32
    %c0_i32_2 = arith.constant 0 : i32
    return %arg0, %c0_i32, %c0_i32_0, %c0_i32_1 : i32, i32, i32, i32
  }
  func.func @transform_1(%arg0: i32) -> (i32, i32, i32, i32) {
    %c0_i32 = arith.constant 0 : i32
    %c0_i32_0 = arith.constant 0 : i32
    %c0_i32_1 = arith.constant 0 : i32
    %c0_i32_2 = arith.constant 0 : i32
    return %arg0, %c0_i32, %c0_i32_0, %c0_i32_1 : i32, i32, i32, i32
  }
  func.func @transform_2(%arg0: i32) -> (i32, i32, i32, i32) {
    %c0_i32 = arith.constant 0 : i32
    %c0_i32_0 = arith.constant 0 : i32
    %c0_i32_1 = arith.constant 0 : i32
    %c0_i32_2 = arith.constant 0 : i32
    return %arg0, %c0_i32, %c0_i32_0, %c0_i32_1 : i32, i32, i32, i32
  }
  func.func @transform_3(%arg0: i32) -> (i32, i32, i32, i32) {
    %c0_i32 = arith.constant 0 : i32
    %c0_i32_0 = arith.constant 0 : i32
    %c0_i32_1 = arith.constant 0 : i32
    %c0_i32_2 = arith.constant 0 : i32
    return %arg0, %c0_i32, %c0_i32_0, %c0_i32_1 : i32, i32, i32, i32
  }
}

module attributes {stable_mosaic.version = 11 : i64} {
  func.func @_ffn_geglu_kernel(%arg0: i32, %arg1: i32, %arg2: memref<16x32xf32, #tpu.memory_space<vmem>>, %arg3: memref<1x32xf32, #tpu.memory_space<vmem>>, %arg4: memref<1x32xf32, #tpu.memory_space<vmem>>, %arg5: memref<32x128xf32, #tpu.memory_space<vmem>>, %arg6: memref<1x128xf32, #tpu.memory_space<vmem>>, %arg7: memref<32x128xf32, #tpu.memory_space<vmem>>, %arg8: memref<1x128xf32, #tpu.memory_space<vmem>>, %arg9: memref<128x32xf32, #tpu.memory_space<vmem>>, %arg10: memref<1x32xf32, #tpu.memory_space<vmem>>, %arg11: memref<16x32xf32, #tpu.memory_space<vmem>>, %arg12: memref<16x32xf32, #tpu.memory_space<vmem>>) attributes {dimension_semantics = [#tpu.dimension_semantics<parallel>, #tpu.dimension_semantics<arbitrary>], iteration_bounds = array<i64: 1, 1>, scalar_prefetch = 0 : i64, scratch_operands = 1 : i64, tpu.core_type = #tpu.core_type<tc>, window_params = [{transform_indices = @transform_0, window_bounds = array<i64: 16, 32>}, {pipeline_mode = #tpu.pipeline_mode<synchronous>, transform_indices = @transform_1, window_bounds = array<i64: 1, 32>}, {pipeline_mode = #tpu.pipeline_mode<synchronous>, transform_indices = @transform_2, window_bounds = array<i64: 1, 32>}, {transform_indices = @transform_3, window_bounds = array<i64: 32, 128>}, {transform_indices = @transform_4, window_bounds = array<i64: 1, 128>}, {transform_indices = @transform_5, window_bounds = array<i64: 32, 128>}, {transform_indices = @transform_6, window_bounds = array<i64: 1, 128>}, {transform_indices = @transform_7, window_bounds = array<i64: 128, 32>}, {pipeline_mode = #tpu.pipeline_mode<synchronous>, transform_indices = @transform_8, window_bounds = array<i64: 1, 32>}, {transform_indices = @transform_9, window_bounds = array<i64: 16, 32>}]} {
    %c0_i32 = arith.constant 0 : i32
    %0 = arith.cmpi eq, %arg1, %c0_i32 : i32
    %1 = arith.extui %0 : i1 to i32
    %c0_i32_0 = arith.constant 0 : i32
    %2 = arith.cmpi ne, %1, %c0_i32_0 : i32
    scf.if %2 {
      %cst_32 = arith.constant 0.000000e+00 : f32
      %55 = vector.broadcast %cst_32 : f32 to vector<16x32xf32>
      %c0_33 = arith.constant 0 : index
      %c0_34 = arith.constant 0 : index
      %56 = vector.load %arg12[%c0_33, %c0_34] : memref<16x32xf32, #tpu.memory_space<vmem>>, vector<16x32xf32>
      tpu.vector_store %arg12[%c0_33, %c0_34], %55 {strides = array<i32>} : memref<16x32xf32, #tpu.memory_space<vmem>>, vector<16x32xf32>,
    } else {
    }
    %c0 = arith.constant 0 : index
    %c0_1 = arith.constant 0 : index
    %3 = vector.load %arg2[%c0, %c0_1] : memref<16x32xf32, #tpu.memory_space<vmem>>, vector<16x32xf32>
    %c0_2 = arith.constant 0 : index
    %c0_3 = arith.constant 0 : index
    %4 = vector.load %arg3[%c0_2, %c0_3] : memref<1x32xf32, #tpu.memory_space<vmem>>, vector<1x32xf32>
    %c0_4 = arith.constant 0 : index
    %c0_5 = arith.constant 0 : index
    %5 = vector.load %arg4[%c0_4, %c0_5] : memref<1x32xf32, #tpu.memory_space<vmem>>, vector<1x32xf32>
    %cst = arith.constant dense<0.000000e+00> : vector<16xf32>
    %6 = vector.multi_reduction <add>, %3, %cst [1] : vector<16x32xf32> to vector<16xf32>
    %7 = vector.shape_cast %6 : vector<16xf32> to vector<16x1xf32>
    %cst_6 = arith.constant 3.200000e+01 : f32
    %8 = vector.broadcast %cst_6 : f32 to vector<16x1xf32>
    %9 = arith.divf %7, %8 : vector<16x1xf32>
    %10 = vector.broadcast %9 : vector<16x1xf32> to vector<16x32xf32>
    %11 = arith.subf %3, %10 : vector<16x32xf32>
    %12 = arith.mulf %11, %11 : vector<16x32xf32>
    %cst_7 = arith.constant dense<0.000000e+00> : vector<16xf32>
    %13 = vector.multi_reduction <add>, %12, %cst_7 [1] : vector<16x32xf32> to vector<16xf32>
    %14 = vector.shape_cast %13 : vector<16xf32> to vector<16x1xf32>
    %cst_8 = arith.constant 3.200000e+01 : f32
    %15 = vector.broadcast %cst_8 : f32 to vector<16x1xf32>
    %16 = arith.divf %14, %15 : vector<16x1xf32>
    %17 = vector.broadcast %9 : vector<16x1xf32> to vector<16x32xf32>
    %18 = arith.subf %3, %17 : vector<16x32xf32>
    %cst_9 = arith.constant 9.99999974E-6 : f32
    %19 = vector.broadcast %cst_9 : f32 to vector<16x1xf32>
    %20 = arith.addf %16, %19 : vector<16x1xf32>
    %21 = math.rsqrt %20 : vector<16x1xf32>
    %22 = vector.broadcast %21 : vector<16x1xf32> to vector<16x32xf32>
    %23 = arith.mulf %18, %22 : vector<16x32xf32>
    %24 = vector.broadcast %4 : vector<1x32xf32> to vector<16x32xf32>
    %25 = arith.mulf %23, %24 : vector<16x32xf32>
    %26 = vector.broadcast %5 : vector<1x32xf32> to vector<16x32xf32>
    %27 = arith.addf %25, %26 : vector<16x32xf32>
    %c0_10 = arith.constant 0 : index
    %c0_11 = arith.constant 0 : index
    %28 = vector.load %arg5[%c0_10, %c0_11] : memref<32x128xf32, #tpu.memory_space<vmem>>, vector<32x128xf32>
    %cst_12 = arith.constant dense<0.000000e+00> : vector<16x128xf32>
    %29 = tpu.matmul %27, %28, %cst_12 {dimension_numbers = #tpu.dot_dimension_numbers<[1], [0], [0], [1], [0, 0, 1, 1], [], []>} : vector<16x32xf32>, vector<32x128xf32>, vector<16x128xf32> -> vector<16x128xf32>
    %c0_13 = arith.constant 0 : index
    %c0_14 = arith.constant 0 : index
    %30 = vector.load %arg6[%c0_13, %c0_14] : memref<1x128xf32, #tpu.memory_space<vmem>>, vector<1x128xf32>
    %31 = vector.broadcast %30 : vector<1x128xf32> to vector<16x128xf32>
    %32 = arith.addf %29, %31 : vector<16x128xf32>
    %c0_15 = arith.constant 0 : index
    %c0_16 = arith.constant 0 : index
    %33 = vector.load %arg7[%c0_15, %c0_16] : memref<32x128xf32, #tpu.memory_space<vmem>>, vector<32x128xf32>
    %cst_17 = arith.constant dense<0.000000e+00> : vector<16x128xf32>
    %34 = tpu.matmul %27, %33, %cst_17 {dimension_numbers = #tpu.dot_dimension_numbers<[1], [0], [0], [1], [0, 0, 1, 1], [], []>} : vector<16x32xf32>, vector<32x128xf32>, vector<16x128xf32> -> vector<16x128xf32>
    %c0_18 = arith.constant 0 : index
    %c0_19 = arith.constant 0 : index
    %35 = vector.load %arg8[%c0_18, %c0_19] : memref<1x128xf32, #tpu.memory_space<vmem>>, vector<1x128xf32>
    %36 = vector.broadcast %35 : vector<1x128xf32> to vector<16x128xf32>
    %37 = arith.addf %34, %36 : vector<16x128xf32>
    %cst_20 = arith.constant 5.000000e-01 : f32
    %38 = vector.broadcast %cst_20 : f32 to vector<16x128xf32>
    %39 = arith.mulf %38, %37 : vector<16x128xf32>
    %cst_21 = arith.constant 0.707106769 : f32
    %40 = vector.broadcast %cst_21 : f32 to vector<16x128xf32>
    %41 = arith.mulf %37, %40 : vector<16x128xf32>
    %42 = math.erf %41 : vector<16x128xf32>
    %cst_22 = arith.constant 1.000000e+00 : f32
    %43 = vector.broadcast %cst_22 : f32 to vector<16x128xf32>
    %44 = arith.addf %43, %42 : vector<16x128xf32>
    %45 = arith.mulf %39, %44 : vector<16x128xf32>
    %46 = arith.mulf %32, %45 : vector<16x128xf32>
    %c0_23 = arith.constant 0 : index
    %c0_24 = arith.constant 0 : index
    %47 = vector.load %arg12[%c0_23, %c0_24] : memref<16x32xf32, #tpu.memory_space<vmem>>, vector<16x32xf32>
    %c0_25 = arith.constant 0 : index
    %c0_26 = arith.constant 0 : index
    %48 = vector.load %arg9[%c0_25, %c0_26] : memref<128x32xf32, #tpu.memory_space<vmem>>, vector<128x32xf32>
    %cst_27 = arith.constant dense<0.000000e+00> : vector<16x32xf32>
    %49 = tpu.matmul %46, %48, %cst_27 {dimension_numbers = #tpu.dot_dimension_numbers<[1], [0], [0], [1], [0, 0, 1, 1], [], []>} : vector<16x128xf32>, vector<128x32xf32>, vector<16x32xf32> -> vector<16x32xf32>
    %50 = arith.addf %47, %49 : vector<16x32xf32>
    %c0_28 = arith.constant 0 : index
    %c0_29 = arith.constant 0 : index
    %51 = vector.load %arg12[%c0_28, %c0_29] : memref<16x32xf32, #tpu.memory_space<vmem>>, vector<16x32xf32>
    tpu.vector_store %arg12[%c0_28, %c0_29], %50 {strides = array<i32>} : memref<16x32xf32, #tpu.memory_space<vmem>>, vector<16x32xf32>,
    %c0_i32_30 = arith.constant 0 : i32
    %52 = arith.cmpi eq, %arg1, %c0_i32_30 : i32
    %53 = arith.extui %52 : i1 to i32
    %c0_i32_31 = arith.constant 0 : i32
    %54 = arith.cmpi ne, %53, %c0_i32_31 : i32
    scf.if %54 {
      %c0_32 = arith.constant 0 : index
      %c0_33 = arith.constant 0 : index
      %55 = vector.load %arg12[%c0_32, %c0_33] : memref<16x32xf32, #tpu.memory_space<vmem>>, vector<16x32xf32>
      %c0_34 = arith.constant 0 : index
      %c0_35 = arith.constant 0 : index
      %56 = vector.load %arg10[%c0_34, %c0_35] : memref<1x32xf32, #tpu.memory_space<vmem>>, vector<1x32xf32>
      %57 = vector.broadcast %56 : vector<1x32xf32> to vector<16x32xf32>
      %58 = arith.addf %55, %57 : vector<16x32xf32>
      %59 = arith.addf %58, %3 : vector<16x32xf32>
      %c0_36 = arith.constant 0 : index
      %c0_37 = arith.constant 0 : index
      %60 = vector.load %arg11[%c0_36, %c0_37] : memref<16x32xf32, #tpu.memory_space<vmem>>, vector<16x32xf32>
      tpu.vector_store %arg11[%c0_36, %c0_37], %59 {strides = array<i32>} : memref<16x32xf32, #tpu.memory_space<vmem>>, vector<16x32xf32>,
    } else {
    }
    return
  }
  func.func @transform_0(%arg0: i32, %arg1: i32) -> (i32, i32) {
    %c0_i32 = arith.constant 0 : i32
    %c0_i32_0 = arith.constant 0 : i32
    return %arg0, %c0_i32 : i32, i32
  }
  func.func @transform_1(%arg0: i32, %arg1: i32) -> (i32, i32) {
    %c0_i32 = arith.constant 0 : i32
    %c0_i32_0 = arith.constant 0 : i32
    %c0_i32_1 = arith.constant 0 : i32
    return %c0_i32, %c0_i32_0 : i32, i32
  }
  func.func @transform_2(%arg0: i32, %arg1: i32) -> (i32, i32) {
    %c0_i32 = arith.constant 0 : i32
    %c0_i32_0 = arith.constant 0 : i32
    %c0_i32_1 = arith.constant 0 : i32
    return %c0_i32, %c0_i32_0 : i32, i32
  }
  func.func @transform_3(%arg0: i32, %arg1: i32) -> (i32, i32) {
    %c0_i32 = arith.constant 0 : i32
    %c0_i32_0 = arith.constant 0 : i32
    return %c0_i32, %arg1 : i32, i32
  }
  func.func @transform_4(%arg0: i32, %arg1: i32) -> (i32, i32) {
    %c0_i32 = arith.constant 0 : i32
    %c0_i32_0 = arith.constant 0 : i32
    return %c0_i32, %arg1 : i32, i32
  }
  func.func @transform_5(%arg0: i32, %arg1: i32) -> (i32, i32) {
    %c0_i32 = arith.constant 0 : i32
    %c0_i32_0 = arith.constant 0 : i32
    return %c0_i32, %arg1 : i32, i32
  }
  func.func @transform_6(%arg0: i32, %arg1: i32) -> (i32, i32) {
    %c0_i32 = arith.constant 0 : i32
    %c0_i32_0 = arith.constant 0 : i32
    return %c0_i32, %arg1 : i32, i32
  }
  func.func @transform_7(%arg0: i32, %arg1: i32) -> (i32, i32) {
    %c0_i32 = arith.constant 0 : i32
    %c0_i32_0 = arith.constant 0 : i32
    return %arg1, %c0_i32 : i32, i32
  }
  func.func @transform_8(%arg0: i32, %arg1: i32) -> (i32, i32) {
    %c0_i32 = arith.constant 0 : i32
    %c0_i32_0 = arith.constant 0 : i32
    %c0_i32_1 = arith.constant 0 : i32
    return %c0_i32, %c0_i32_0 : i32, i32
  }
  func.func @transform_9(%arg0: i32, %arg1: i32) -> (i32, i32) {
    %c0_i32 = arith.constant 0 : i32
    %c0_i32_0 = arith.constant 0 : i32
    return %arg0, %c0_i32 : i32, i32
  }
}

</mosaic_0001>

<bundles_post_ra>
// kernel: basic_transformer_block.12
= control target key start
LH: loop header
LB: loop body
LE: loop exit
PB: predicated region body
PF: predicated region fallthrough
CT: control target
= control target key end

     0   :  { %vm20_vm0 = vcmask 392192   ;;  %vm56_vm1 = vcmask 523264   ;;  %s130_s1 = inlined_call_operand.vmem [shape: f32[48,64], index: 1, kind: input, shape index: {}]   ;;  %s131_s0 = inlined_call_operand.vmem [shape: f32[24,48], index: 0, kind: input, shape index: {}]   ;;  %s132_s2 = inlined_call_operand.vmem [shape: f32[24,64], index: 2, kind: output, shape index: {}]  }
   0x1   :  { %v19_v0 = vld [vmem:[%s130_s1 + $0x28] sm:$0xff]  ;;  %v18_v1 = vld [vmem:[%s130_s1 + $0x20] sm:$0xff]  ;;  %v17_v2 = vld [vmem:[%s130_s1 + $0x18] sm:$0xff] }
   0x2   :  { %68 = vmatpush.msra.mxu2 %v19_v0  ;;  %40 = vmatpush.msra.mxu0 %v19_v0  ;;  %v16_v3 = vld [vmem:[%s130_s1 + $0x10] sm:$0xff]  ;;  %v15_v4 = vld [vmem:[%s130_s1 + $0x8] sm:$0xff]  ;;  %v14_v5 = vld [vmem:[%s130_s1] sm:$0xff] }
   0x3   :  { %67 = vmatpush.msra.mxu1 %v19_v0  ;;  %v13_v6 = vld [vmem:[%s131_s0 + $0x10] sm:$0xff]  ;;  %v11_v7 = vld [vmem:[%s131_s0] sm:$0xff]  ;;  %v12_v8 = vld [vmem:[%s131_s0 + $0x8] sm:$0xff] }
   0x4   :  { %70 = vmatpush.msra.mxu2 %v18_v1  ;;  %41 = vmatpush.msra.mxu0 %v18_v1 }
   0x5   :  { %69 = vmatpush.msra.mxu1 %v18_v1 }
   0x6   :  { %72 = vmatpush.msra.mxu2 %v17_v2  ;;  %42 = vmatpush.msra.mxu0 %v17_v2 }
   0x7   :  { %71 = vmatpush.msra.mxu1 %v17_v2 }
   0x8   :  { %74 = vmatpush.msra.mxu2 %v16_v3  ;;  %43 = vmatpush.msra.mxu0 %v16_v3 }
   0x9   :  { %73 = vmatpush.msra.mxu1 %v16_v3 }
   0xa   :  { %76 = vmatpush.msra.mxu2 %v15_v4  ;;  %44 = vmatpush.msra.mxu0 %v15_v4 }
   0xb   :  { %75 = vmatpush.msra.mxu1 %v15_v4 }
   0xc   :  { %78 = vmatpush.msra.mxu2 %v14_v5  ;;  %45 = vmatpush.msra.mxu0 %v14_v5 }
   0xd   :  { %66 = vmatmul.msk.f32.vlgmr.msra.gmra.mxu2 %vm20_vm0, %v13_v6  ;;  %77 = vmatpush.msra.mxu1 %v14_v5 }
   0xe   :  { %64 = vmatmul.msk.f32.vlgmr.msra.gmra.mxu0 %vm20_vm0, %v11_v7  ;;  %65 = vmatmul.msk.f32.vlgmr.msra.gmra.mxu1 %vm20_vm0, %v12_v8 }
  0x8b   :  { %v47_v9 = vpop.f32.mrf.mxu0  ;;  %v50_v10 = vpop.f32.mrf.mxu1 }
  0x8c   :  { %57 = vst.msk [vmem:[%s132_s2] sm:$0xff] %vm56_vm1, %v47_v9 }
  0x8d   :  { %58 = vst.msk [vmem:[%s132_s2 + $0x8] sm:$0xff] %vm56_vm1, %v50_v10 }
  0x90   :  { %v53_v11 = vpop.f32.mrf.mxu2 }
  0x91   :  { %59 = vst.msk [vmem:[%s132_s2 + $0x10] sm:$0xff] %vm56_vm1, %v53_v11 }

// kernel: basic_transformer_block.8
= control target key start
LH: loop header
LB: loop body
LE: loop exit
PB: predicated region body
PF: predicated region fallthrough
CT: control target
= control target key end

     0   :  { %9 = vsyncpa [#allocation3], 0  ;;  %s282_s0 = inlined_call_operand.hbm [shape: f32[16,32], index: 0, kind: input, shape index: {}]   ;;  %s283_s1 = inlined_call_operand.vmem [shape: f32[1,32], index: 1, kind: input, shape index: {}]   ;;  %s284_s2 = inlined_call_operand.vmem [shape: f32[1,32], index: 2, kind: input, shape index: {}]   ;;  %s285_s3 = inlined_call_operand.hbm [shape: f32[32,96], index: 3, kind: input, shape index: {}]   ;;  %s286_s4 = inlined_call_operand.vmem [shape: f32[16,96], index: 4, kind: output, shape index: {}]  }
   0x1   :  { %s15_s17 = sshll.u32 %s282_s0, 4  ;;  %s16_s17 = int_to_ptr.hbm [resolvable:$true] %s15_s17 }
   0x2   :  { %10 = vsyncpa [#allocation5], 0  ;;  %s228_s18 = smov [#allocation2]   ;;  %s32_s22 = sshll.u32 %s285_s3, 4  ;;  %s33_s22 = int_to_ptr.hbm [resolvable:$true] %s32_s22 }
   0x3   :  { %s17_s19 = sshll.u32 %s228_s18, 4  ;;  %s229_s23 = smov 128   ;;  %s18_s19 = int_to_ptr.vmem [resolvable:$true] %s17_s19 }
   0x4   :  { %s230_s24 = smov 8   ;;  %s231_s25 = smov [#allocation4]  }
   0x5   :  { %23 = dma.hbm_to_vmem [thread:$0]  %s16_s17, 256, %s18_s19, [#allocation3], %s229_s23, %s229_s23, %s230_s24  }
   0x6   :  { %s34_s26 = sshll.u32 %s231_s25, 4  ;;  %s35_s26 = int_to_ptr.vmem [resolvable:$true] %s34_s26 }
   0x7   :  { %40 = dma.hbm_to_vmem [thread:$0]  %s33_s22, 512, %s35_s26, [#allocation5], %s229_s23, %s229_s23, %s230_s24  }
   0x8   :  { %224 = dma.done.wait [#allocation3], 256  }
   0x9   :  { %225 = vsyncadd [#allocation3], 4294967040 }
   0xa   :  { %226 = dma.done.wait [#allocation5], 512  }
   0xb   :  { %227 = vsyncadd [#allocation5], 4294966784  ;;  %vm53_vm0 = vcmask 261120   ;;  %v49_v0 = vld [vmem:[#allocation2] sm:$0xff]  ;;  %v50_v2 = vld [vmem:[#allocation2 + $0x8] sm:$0xff]  ;;  %v232_v4 = vmov 32.0  }
   0xc   :  { %v54_v1 = vsel %vm53_vm0, %v49_v0, 0.0  ;;  %v57_v3 = vsel %vm53_vm0, %v50_v2, 0.0  ;;  %170 = vrcp.f32 %v232_v4  ;;  %v118_v21 = vld [vmem:[#allocation4 + $0x18] sm:$0xff]  ;;  %v117_v22 = vld [vmem:[#allocation4 + $0x10] sm:$0xff]  ;;  %v116_v23 = vld [vmem:[#allocation4 + $0x8] sm:$0xff]  ;;  %vm148_vm8 = vcmask 785408  }
   0xd   :  { %55 = vadd.xlane.f32.xlu0 %v54_v1  ;;  %137 = vmatpush.msra.mxu0 %v118_v21  ;;  %v115_v24 = vld [vmem:[#allocation4] sm:$0xff]  ;;  %v168_v39 = vld [vmem:[%s283_s1] ss:$0 sm:$0xff] }
   0xe   :  { %159 = vmatpush.msra.mxu1 %v118_v21  ;;  %v169_v43 = vld [vmem:[%s284_s2] ss:$0 sm:$0xff] }
   0xf   :  { %138 = vmatpush.msra.mxu0 %v117_v22 }
  0x10   :  { %160 = vmatpush.msra.mxu1 %v117_v22 }
  0x11   :  { %139 = vmatpush.msra.mxu0 %v116_v23 }
  0x12   :  { %v171_v5 = vpop.eup %170  ;;  %161 = vmatpush.msra.mxu1 %v116_v23 }
  0x13   :  { %v61_v6 = vmul.f32 32.0, %v171_v5  ;;  %vm65_vm1 = vweird.f32 %v171_v5  ;;  %140 = vmatpush.msra.mxu0 %v115_v24 }
  0x14   :  { %162 = vmatpush.msra.mxu1 %v115_v24 }
  0x15   :  { %58 = vadd.xlane.f32.xlu0 %v57_v3  ;;  %v62_v7 = vsub.f32 1.0, %v61_v6 }
  0x17   :  { %v63_v8 = vmul.f32 %v171_v5, %v62_v7 }
  0x19   :  { %v64_v9 = vadd.f32 %v171_v5, %v63_v8 }
  0x1b   :  { %v66_v10 = vsel %vm65_vm1, %v171_v5, %v64_v9 }
  0x80   :  { %v56_v11 = vpop.xlane.xlu0 %55 }
  0x81   :  { %v67_v12 = vmul.f32 %v66_v10, %v56_v11 }
  0x83   :  { %v69_v13 = vsub.f32 %v49_v0, %v67_v12 }
  0x85   :  { %v71_v14 = vmul.f32 %v69_v13, %v69_v13 }
  0x87   :  { %v73_v15 = vsel %vm53_vm0, %v71_v14, 0.0 }
  0x88   :  { %74 = vadd.xlane.f32.xlu1 %v73_v15  ;;  %v59_v16 = vpop.xlane.xlu0 %58 }
  0x89   :  { %v68_v17 = vmul.f32 %v66_v10, %v59_v16 }
  0x8b   :  { %v70_v18 = vsub.f32 %v50_v2, %v68_v17 }
  0x8d   :  { %v72_v19 = vmul.f32 %v70_v18, %v70_v18 }
  0x8f   :  { %v76_v20 = vsel %vm53_vm0, %v72_v19, 0.0 }
  0x90   :  { %77 = vadd.xlane.f32.xlu1 %v76_v20 }
  0xfb   :  { %v75_v25 = vpop.xlane.xlu1 %74 }
  0xfc   :  { %v79_v26 = vmul.f32 %v75_v25, %v66_v10 }
  0xfe   :  { %v81_v27 = vadd.f32 1e-05, %v79_v26 }
 0x100   :  { %172 = vrsqrt.f32 %v81_v27  ;;  %vm89_vm3 = vweird.f32 %v81_v27 }
 0x103   :  { %v78_v28 = vpop.xlane.xlu1 %77 }
 0x104   :  { %v80_v29 = vmul.f32 %v78_v28, %v66_v10 }
 0x106   :  { %v173_v30 = vpop.eup %172  ;;  %v82_v31 = vadd.f32 1e-05, %v80_v29 }
 0x107   :  { %v84_v32 = vmul.f32 %v173_v30, %v81_v27  ;;  %vm90_vm2 = vweird.f32 %v173_v30 }
 0x108   :  { %174 = vrsqrt.f32 %v82_v31  ;;  %vm91_vm4 = vmor %vm89_vm3, %vm90_vm2  ;;  %vm99_vm6 = vweird.f32 %v82_v31 }
 0x109   :  { %v85_v33 = vmul.f32 %v173_v30, %v84_v32 }
 0x10b   :  { %v86_v34 = vmul.f32 0.5, %v85_v33 }
 0x10d   :  { %v87_v35 = vsub.f32 1.5, %v86_v34 }
 0x10e   :  { %v175_v36 = vpop.eup %174 }
 0x10f   :  { %v88_v37 = vmul.f32 %v173_v30, %v87_v35  ;;  %v94_v38 = vmul.f32 %v175_v36, %v82_v31  ;;  %vm100_vm5 = vweird.f32 %v175_v36 }
 0x110   :  { %vm101_vm7 = vmor %vm99_vm6, %vm100_vm5 }
 0x111   :  { %v92_v40 = vsel %vm91_vm4, %v173_v30, %v88_v37  ;;  %v95_v41 = vmul.f32 %v175_v36, %v94_v38 }
 0x112   :  { %v103_v42 = vmul.f32 %v92_v40, %v69_v13 }
 0x113   :  { %v96_v44 = vmul.f32 0.5, %v95_v41 }
 0x114   :  { %v108_v45 = vmul.f32 %v168_v39, %v103_v42 }
 0x115   :  { %v97_v46 = vsub.f32 1.5, %v96_v44 }
 0x116   :  { %v113_v47 = vadd.f32 %v169_v43, %v108_v45 }
 0x117   :  { %v98_v48 = vmul.f32 %v175_v36, %v97_v46 }
 0x118   :  { %157 = vmatmul.msk.f32.vlgmr.msra.gmra.mxu0 %vm53_vm0, %v113_v47 }
 0x119   :  { %v102_v49 = vsel %vm101_vm7, %v175_v36, %v98_v48 }
 0x11a   :  { %v104_v50 = vmul.f32 %v102_v49, %v70_v18 }
 0x11c   :  { %v109_v51 = vmul.f32 %v168_v39, %v104_v50 }
 0x11e   :  { %v114_v52 = vadd.f32 %v169_v43, %v109_v51 }
 0x120   :  { %158 = vmatmul.msk.f32.vlgmr.msra.gmra.mxu1 %vm53_vm0, %v114_v52 }
 0x195   :  { %v142_v53 = vpop.f32.mrf.mxu0 }
 0x196   :  { %149 = vst.msk [vmem:[%s286_s4] sm:$0xff] %vm148_vm8, %v142_v53 }
 0x19d   :  { %v145_v54 = vpop.f32.mrf.mxu1 }
 0x19e   :  { %150 = vst.msk [vmem:[%s286_s4 + $0x8] sm:$0xff] %vm148_vm8, %v145_v54 }
 0x19f   :  { %155 = vsyncpa [#allocation3], 1 }
 0x1a0   :  { %156 = vsyncpa [#allocation5], 1 }

// kernel: basic_transformer_block.9
= control target key start
LH: loop header
LB: loop body
LE: loop exit
PB: predicated region body
PF: predicated region fallthrough
CT: control target
= control target key end

     0   :  { %s491_s12 = smov 0   ;;  %s532_s0 = inlined_call_operand.vmem [shape: f32[2,2,8,16], index: 0, kind: input, shape index: {}]   ;;  %s533_s1 = inlined_call_operand.vmem [shape: f32[2,2,8,16], index: 1, kind: input, shape index: {}]   ;;  %s534_s2 = inlined_call_operand.vmem [shape: f32[2,2,8,16], index: 2, kind: input, shape index: {}]   ;;  %s535_s3 = inlined_call_operand.vmem [shape: f32[2,2,8,16], index: 3, kind: output, shape index: {}]  }
   0x1 LB: > { %s422_s13 = sadd.s32 4294967295, %s469_s12   ;;  %p426_p0 = scmp.ge.s32.totalorder %s469_s12, 1  ;;  %s469_s12 = sphi %s491_s12, %s13_s12  }
   0x2   : > { %p157_p1 = scmp.lt.s32.totalorder %s469_s12, 3 }
   0x4   : > { %p158_p2 = pnand %p426_p0, %p157_p1 }
   0x5   : > { %p191_p3 = scmp.lt.s32.totalorder (!%p158_p2), %s422_s13, 1 }
   0x6   : > { %161 = sbr.rel (%p158_p2) target bundleno = 539 (0x21b), region = 32 }
   0xb   : > { %s537_s13 = smov (!%p191_p3, %s422_s13), 1  ;;  %vm219_vm0 = vcmask 130048   ;;  %vm272_vm1 = vcmask 64512  }
   0xc   : > { %s499_s14 = sshll.u32 %s537_s13, 4 }
   0xd   : > { %s200_s17 = scalar_lea.vmem %s533_s1, %s499_s14  ;;  %s195_s20 = scalar_lea.vmem %s532_s0, %s499_s14 }
   0xe   : > { %v215_v0 = vld [vmem:[%s200_s17] sm:$0xff]  ;;  %v216_v2 = vld [vmem:[%s200_s17 + $0x8] sm:$0xff]  ;;  %s205_s23 = scalar_lea.vmem %s534_s2, %s499_s14  ;;  %s210_s26 = scalar_lea.vmem %s535_s3, %s499_s14 }
   0xf   : > { %v211_v1 = vld [vmem:[%s195_s20] sm:$0xff]  ;;  %435 = vmatpush.xpose.msk.msra.mxu0 %vm219_vm0, %v215_v0  ;;  %437 = vmatpush.xpose.msk.msra.mxu1 %vm219_vm0, %v216_v2  ;;  %v212_v4 = vld [vmem:[%s195_s20 + $0x8] sm:$0xff] }
  0x10   : > { %v213_v3 = vmul.f32 0.25, %v211_v1  ;;  %v214_v5 = vmul.f32 0.25, %v212_v4  ;;  %v217_v20 = vld [vmem:[%s205_s23] sm:$0xff]  ;;  %v218_v21 = vld [vmem:[%s205_s23 + $0x8] sm:$0xff] }
  0x11   : > { %313 = vmatpush.msra.mxu2 %v217_v20  ;;  %336 = vmatpush.msra.mxu3 %v218_v21 }
  0x12   : > { %436 = vmatmul.msk.f32.vlgmr.msra.gmra.mxu0 %vm219_vm0, %v213_v3  ;;  %438 = vmatmul.msk.f32.vlgmr.msra.gmra.mxu1 %vm219_vm0, %v214_v5 }
  0x8f   : > { %v243_v6 = vpop.f32.mrf.mxu0  ;;  %v269_v8 = vpop.f32.mrf.mxu1 }
  0x90   : > { %v273_v7 = vsel %vm272_vm1, %v243_v6, -inf  ;;  %v276_v9 = vsel %vm272_vm1, %v269_v8, -inf }
  0x91   : > { %274 = vmax.xlane.f32.xlu0 %v273_v7 }
  0x99   : > { %277 = vmax.xlane.f32.xlu0 %v276_v9 }
 0x104   : > { %v275_v10 = vpop.xlane.xlu0 %274 }
 0x105   : > { %v279_v11 = vsub.f32 %v243_v6, %v275_v10 }
 0x107   : > { %v281_v12 = vmul.f32 1.442695, %v279_v11 }
 0x109   : > { %455 = vpow2.f32 %v281_v12 }
 0x10c   : > { %v278_v13 = vpop.xlane.xlu0 %277 }
 0x10d   : > { %v280_v14 = vsub.f32 %v269_v8, %v278_v13 }
 0x10f   : > { %v456_v15 = vpop.eup %455  ;;  %v283_v16 = vmul.f32 1.442695, %v280_v14 }
 0x110   : > { %v285_v17 = vsel %vm272_vm1, %v456_v15, 0.0 }
 0x111   : > { %457 = vpow2.f32 %v283_v16  ;;  %286 = vadd.xlane.f32.xlu1 %v285_v17 }
 0x117   : > { %v458_v18 = vpop.eup %457 }
 0x118   : > { %v288_v19 = vsel %vm272_vm1, %v458_v18, 0.0 }
 0x119   : > { %289 = vadd.xlane.f32.xlu1 %v288_v19 }
 0x184   : > { %v287_v22 = vpop.xlane.xlu1 %286 }
 0x185   : > { %459 = vrcp.f32 %v287_v22 }
 0x18b   : > { %v460_v23 = vpop.eup %459 }
 0x18c   : > { %v290_v24 = vpop.xlane.xlu1 %289  ;;  %v293_v25 = vmul.f32 %v460_v23, %v456_v15 }
 0x18d   : > { %461 = vrcp.f32 %v290_v24 }
 0x18e   : > { %439 = vmatmul.msk.f32.vlgmr.msra.gmra.mxu2 %vm272_vm1, %v293_v25 }
 0x193   : > { %v462_v26 = vpop.eup %461 }
 0x194   : > { %v294_v27 = vmul.f32 %v462_v26, %v458_v18 }
 0x196   : > { %440 = vmatmul.msk.f32.vlgmr.msra.gmra.mxu3 %vm272_vm1, %v294_v27 }
 0x211   : > { %v315_v28 = vpop.f32.mrf.mxu2 }
 0x212   : > { %341 = vst.msk [vmem:[%s210_s26] sm:$0xff] %vm219_vm0, %v315_v28 }
 0x219   : > { %v338_v29 = vpop.f32.mrf.mxu3 }
 0x21a   : > { %342 = vst.msk [vmem:[%s210_s26 + $0x8] sm:$0xff] %vm219_vm0, %v338_v29 }
 0x21b PF: > { %s13_s12 = sadd.s32 1, %s469_s12  }
 0x21c   : > { %p10_p4 = scmp.ge.s32.totalorder %s13_s12, 4  }
 0x21e   :  { %12 = sbr.rel (!%p10_p4) target bundleno = 1 (0x1), region = 68 }

// kernel: basic_transformer_block.10
= control target key start
LH: loop header
LB: loop body
LE: loop exit
PB: predicated region body
PF: predicated region fallthrough
CT: control target
= control target key end

     0   :  { %vm27_vm0 = vcmask 261120   ;;  %s136_s1 = inlined_call_operand.vmem [shape: f32[32,32], index: 1, kind: input, shape index: {}]   ;;  %s137_s2 = inlined_call_operand.vmem [shape: f32[1,32], index: 2, kind: input, shape index: {}]   ;;  %s138_s0 = inlined_call_operand.vmem [shape: f32[16,32], index: 0, kind: input, shape index: {}]   ;;  %s139_s3 = inlined_call_operand.vmem [shape: f32[16,32], index: 3, kind: input, shape index: {}]   ;;  %s140_s4 = inlined_call_operand.vmem [shape: f32[16,32], index: 4, kind: output, shape index: {}]  }
   0x1   :  { %v22_v0 = vld [vmem:[%s136_s1 + $0x18] sm:$0xff]  ;;  %v21_v1 = vld [vmem:[%s136_s1 + $0x10] sm:$0xff]  ;;  %v20_v2 = vld [vmem:[%s136_s1 + $0x8] sm:$0xff] }
   0x2   :  { %46 = vmatpush.msra.mxu0 %v22_v0  ;;  %69 = vmatpush.msra.mxu1 %v22_v0  ;;  %v19_v3 = vld [vmem:[%s136_s1] sm:$0xff]  ;;  %v18_v5 = vld [vmem:[%s138_s0 + $0x8] sm:$0xff] }
   0x3   :  { %v17_v4 = vld [vmem:[%s138_s0] sm:$0xff]  ;;  %v58_v10 = vld [vmem:[%s139_s3 + $0x8] sm:$0xff] }
   0x4   :  { %47 = vmatpush.msra.mxu0 %v21_v1  ;;  %70 = vmatpush.msra.mxu1 %v21_v1  ;;  %v73_v6 = vld [vmem:[%s137_s2] ss:$0 sm:$0xff] }
   0x5   :  { %v57_v8 = vld [vmem:[%s139_s3] sm:$0xff] }
   0x6   :  { %48 = vmatpush.msra.mxu0 %v20_v2  ;;  %71 = vmatpush.msra.mxu1 %v20_v2 }
   0x8   :  { %49 = vmatpush.msra.mxu0 %v19_v3  ;;  %72 = vmatpush.msra.mxu1 %v19_v3 }
   0x9   :  { %67 = vmatmul.msk.f32.vlgmr.msra.gmra.mxu0 %vm27_vm0, %v17_v4  ;;  %68 = vmatmul.msk.f32.vlgmr.msra.gmra.mxu1 %vm27_vm0, %v18_v5 }
  0x86   :  { %v51_v7 = vpop.f32.mrf.mxu0  ;;  %v54_v9 = vpop.f32.mrf.mxu1 }
  0x87   :  { %v52_v11 = vadd.f32 %v73_v6, %v51_v7  ;;  %v55_v12 = vadd.f32 %v73_v6, %v54_v9 }
  0x89   :  { %v59_v13 = vadd.f32 %v57_v8, %v52_v11  ;;  %v60_v14 = vadd.f32 %v58_v10, %v55_v12 }
  0x8b   :  { %61 = vst.msk [vmem:[%s140_s4] sm:$0xff] %vm27_vm0, %v59_v13 }
  0x8c   :  { %62 = vst.msk [vmem:[%s140_s4 + $0x8] sm:$0xff] %vm27_vm0, %v60_v14 }

// kernel: basic_transformer_block.11
= control target key start
LH: loop header
LB: loop body
LE: loop exit
PB: predicated region body
PF: predicated region fallthrough
CT: control target
= control target key end

     0   :  { %vm21_vm0 = vcmask 261120   ;;  %v137_v4 = vmov 32.0   ;;  %s201_s0 = inlined_call_operand.vmem [shape: f32[16,32], index: 0, kind: input, shape index: {}]   ;;  %s202_s1 = inlined_call_operand.vmem [shape: f32[1,32], index: 1, kind: input, shape index: {}]   ;;  %s203_s2 = inlined_call_operand.vmem [shape: f32[1,32], index: 2, kind: input, shape index: {}]   ;;  %s204_s3 = inlined_call_operand.vmem [shape: f32[32,32], index: 3, kind: input, shape index: {}]   ;;  %s205_s4 = inlined_call_operand.vmem [shape: f32[16,32], index: 4, kind: output, shape index: {}]  }
   0x1   :  { %v17_v0 = vld [vmem:[%s201_s0] sm:$0xff]  ;;  %v18_v2 = vld [vmem:[%s201_s0 + $0x8] sm:$0xff]  ;;  %131 = vrcp.f32 %v137_v4  ;;  %v86_v21 = vld [vmem:[%s204_s3 + $0x18] sm:$0xff] }
   0x2   :  { %v22_v1 = vsel %vm21_vm0, %v17_v0, 0.0  ;;  %v25_v3 = vsel %vm21_vm0, %v18_v2, 0.0  ;;  %105 = vmatpush.msra.mxu0 %v86_v21  ;;  %124 = vmatpush.msra.mxu1 %v86_v21  ;;  %v85_v22 = vld [vmem:[%s204_s3 + $0x10] sm:$0xff]  ;;  %v84_v23 = vld [vmem:[%s204_s3 + $0x8] sm:$0xff]  ;;  %v83_v24 = vld [vmem:[%s204_s3] sm:$0xff] }
   0x3   :  { %23 = vadd.xlane.f32.xlu0 %v22_v1  ;;  %v129_v39 = vld [vmem:[%s202_s1] ss:$0 sm:$0xff] }
   0x4   :  { %106 = vmatpush.msra.mxu0 %v85_v22  ;;  %125 = vmatpush.msra.mxu1 %v85_v22  ;;  %v130_v43 = vld [vmem:[%s203_s2] ss:$0 sm:$0xff] }
   0x6   :  { %107 = vmatpush.msra.mxu0 %v84_v23  ;;  %126 = vmatpush.msra.mxu1 %v84_v23 }
   0x7   :  { %v132_v5 = vpop.eup %131 }
   0x8   :  { %v29_v6 = vmul.f32 32.0, %v132_v5  ;;  %vm33_vm1 = vweird.f32 %v132_v5  ;;  %108 = vmatpush.msra.mxu0 %v83_v24  ;;  %127 = vmatpush.msra.mxu1 %v83_v24 }
   0xa   :  { %v30_v7 = vsub.f32 1.0, %v29_v6 }
   0xb   :  { %26 = vadd.xlane.f32.xlu0 %v25_v3 }
   0xc   :  { %v31_v8 = vmul.f32 %v132_v5, %v30_v7 }
   0xe   :  { %v32_v9 = vadd.f32 %v132_v5, %v31_v8 }
  0x10   :  { %v34_v10 = vsel %vm33_vm1, %v132_v5, %v32_v9 }
  0x76   :  { %v24_v11 = vpop.xlane.xlu0 %23 }
  0x77   :  { %v35_v12 = vmul.f32 %v34_v10, %v24_v11 }
  0x79   :  { %v37_v13 = vsub.f32 %v17_v0, %v35_v12 }
  0x7b   :  { %v39_v14 = vmul.f32 %v37_v13, %v37_v13 }
  0x7d   :  { %v41_v15 = vsel %vm21_vm0, %v39_v14, 0.0 }
  0x7e   :  { %42 = vadd.xlane.f32.xlu1 %v41_v15  ;;  %v27_v16 = vpop.xlane.xlu0 %26 }
  0x7f   :  { %v36_v17 = vmul.f32 %v34_v10, %v27_v16 }
  0x81   :  { %v38_v18 = vsub.f32 %v18_v2, %v36_v17 }
  0x83   :  { %v40_v19 = vmul.f32 %v38_v18, %v38_v18 }
  0x85   :  { %v44_v20 = vsel %vm21_vm0, %v40_v19, 0.0 }
  0x86   :  { %45 = vadd.xlane.f32.xlu1 %v44_v20 }
  0xf1   :  { %v43_v25 = vpop.xlane.xlu1 %42 }
  0xf2   :  { %v47_v26 = vmul.f32 %v43_v25, %v34_v10 }
  0xf4   :  { %v49_v27 = vadd.f32 1e-05, %v47_v26 }
  0xf6   :  { %133 = vrsqrt.f32 %v49_v27  ;;  %vm57_vm3 = vweird.f32 %v49_v27 }
  0xf9   :  { %v46_v28 = vpop.xlane.xlu1 %45 }
  0xfa   :  { %v48_v29 = vmul.f32 %v46_v28, %v34_v10 }
  0xfc   :  { %v134_v30 = vpop.eup %133  ;;  %v50_v31 = vadd.f32 1e-05, %v48_v29 }
  0xfd   :  { %v52_v32 = vmul.f32 %v134_v30, %v49_v27  ;;  %vm58_vm2 = vweird.f32 %v134_v30 }
  0xfe   :  { %135 = vrsqrt.f32 %v50_v31  ;;  %vm59_vm4 = vmor %vm57_vm3, %vm58_vm2  ;;  %vm67_vm6 = vweird.f32 %v50_v31 }
  0xff   :  { %v53_v33 = vmul.f32 %v134_v30, %v52_v32 }
 0x101   :  { %v54_v34 = vmul.f32 0.5, %v53_v33 }
 0x103   :  { %v55_v35 = vsub.f32 1.5, %v54_v34 }
 0x104   :  { %v136_v36 = vpop.eup %135 }
 0x105   :  { %v56_v37 = vmul.f32 %v134_v30, %v55_v35  ;;  %v62_v38 = vmul.f32 %v136_v36, %v50_v31  ;;  %vm68_vm5 = vweird.f32 %v136_v36 }
 0x106   :  { %vm69_vm7 = vmor %vm67_vm6, %vm68_vm5 }
 0x107   :  { %v60_v40 = vsel %vm59_vm4, %v134_v30, %v56_v37  ;;  %v63_v41 = vmul.f32 %v136_v36, %v62_v38 }
 0x108   :  { %v71_v42 = vmul.f32 %v60_v40, %v37_v13 }
 0x109   :  { %v64_v44 = vmul.f32 0.5, %v63_v41 }
 0x10a   :  { %v76_v45 = vmul.f32 %v129_v39, %v71_v42 }
 0x10b   :  { %v65_v46 = vsub.f32 1.5, %v64_v44 }
 0x10c   :  { %v81_v47 = vadd.f32 %v130_v43, %v76_v45 }
 0x10d   :  { %v66_v48 = vmul.f32 %v136_v36, %v65_v46 }
 0x10e   :  { %122 = vmatmul.msk.f32.vlgmr.msra.gmra.mxu0 %vm21_vm0, %v81_v47 }
 0x10f   :  { %v70_v49 = vsel %vm69_vm7, %v136_v36, %v66_v48 }
 0x110   :  { %v72_v50 = vmul.f32 %v70_v49, %v38_v18 }
 0x112   :  { %v77_v51 = vmul.f32 %v129_v39, %v72_v50 }
 0x114   :  { %v82_v52 = vadd.f32 %v130_v43, %v77_v51 }
 0x116   :  { %123 = vmatmul.msk.f32.vlgmr.msra.gmra.mxu1 %vm21_vm0, %v82_v52 }
 0x18b   :  { %v110_v53 = vpop.f32.mrf.mxu0 }
 0x18c   :  { %116 = vst.msk [vmem:[%s205_s4] sm:$0xff] %vm21_vm0, %v110_v53 }
 0x193   :  { %v113_v54 = vpop.f32.mrf.mxu1 }
 0x194   :  { %117 = vst.msk [vmem:[%s205_s4 + $0x8] sm:$0xff] %vm21_vm0, %v113_v54 }

// kernel: basic_transformer_block.13
= control target key start
LH: loop header
LB: loop body
LE: loop exit
PB: predicated region body
PF: predicated region fallthrough
CT: control target
= control target key end

     0   :  { %s512_s12 = smov 0   ;;  %s561_s0 = inlined_call_operand.vmem [shape: f32[2,2,8,16], index: 0, kind: input, shape index: {}]   ;;  %s562_s1 = inlined_call_operand.vmem [shape: f32[2,2,12,16], index: 1, kind: input, shape index: {}]   ;;  %s563_s2 = inlined_call_operand.vmem [shape: f32[2,2,12,16], index: 2, kind: input, shape index: {}]   ;;  %s564_s3 = inlined_call_operand.vmem [shape: f32[2,2,8,16], index: 3, kind: output, shape index: {}]  }
   0x1 LB: > { %s439_s13 = sadd.s32 4294967295, %s490_s12   ;;  %p443_p0 = scmp.ge.s32.totalorder %s490_s12, 1  ;;  %s490_s12 = sphi %s512_s12, %s13_s12  }
   0x2   : > { %p157_p1 = scmp.lt.s32.totalorder %s490_s12, 3 }
   0x4   : > { %p158_p2 = pnand %p443_p0, %p157_p1 }
   0x5   : > { %p191_p3 = scmp.lt.s32.totalorder (!%p158_p2), %s439_s13, 1 }
   0x6   : > { %161 = sbr.rel (%p158_p2) target bundleno = 543 (0x21f), region = 32 }
   0xb   : > { %s566_s13 = smov (!%p191_p3, %s439_s13), 1  ;;  %vm223_vm0 = vcmask 130048   ;;  %vm282_vm1 = vcmask 97280   ;;  %vm308_vm2 = vcmask 1043456  }
   0xc   : > { %s465_s14 = sshll.u32 %s566_s13, 5  ;;  %s464_s15 = sshll.u32 %s566_s13, 4 }
   0xd   : > { %s200_s18 = scalar_lea.vmem %s562_s1, %s465_s14  ;;  %s195_s21 = scalar_lea.vmem %s561_s0, %s464_s15 }
   0xe   : > { %v216_v0 = vld [vmem:[%s200_s18 + $0x8] sm:$0xf]  ;;  %v211_v1 = vld [vmem:[%s195_s21] sm:$0xff]  ;;  %v218_v2 = vld [vmem:[%s200_s18 + $0x18] sm:$0xf]  ;;  %s205_s24 = scalar_lea.vmem %s563_s2, %s465_s14  ;;  %s210_s27 = scalar_lea.vmem %s564_s3, %s464_s15 }
   0xf   : > { %452 = vmatpush.xpose.msk.msra.mxu0 %vm223_vm0, %v216_v0  ;;  %v215_v3 = vld [vmem:[%s200_s18] sm:$0xff]  ;;  %455 = vmatpush.xpose.msk.msra.mxu1 %vm223_vm0, %v218_v2  ;;  %v212_v4 = vld [vmem:[%s195_s21 + $0x8] sm:$0xff]  ;;  %v217_v5 = vld [vmem:[%s200_s18 + $0x10] sm:$0xff]  ;;  %v213_v6 = vmul.f32 0.25, %v211_v1 }
  0x10   : > { %v214_v7 = vmul.f32 0.25, %v212_v4  ;;  %v220_v22 = vld [vmem:[%s205_s24 + $0x8] sm:$0xf]  ;;  %v219_v23 = vld [vmem:[%s205_s24] sm:$0xff]  ;;  %v222_v24 = vld [vmem:[%s205_s24 + $0x18] sm:$0xf] }
  0x11   : > { %458 = vmatpush.msk.msra.mxu2 %vm308_vm2, %v220_v22  ;;  %v221_v25 = vld [vmem:[%s205_s24 + $0x10] sm:$0xff]  ;;  %460 = vmatpush.msk.msra.mxu3 %vm308_vm2, %v222_v24 }
  0x13   : > { %453 = vmatpush.xpose.msk.msra.mxu0 %vm223_vm0, %v215_v3  ;;  %456 = vmatpush.xpose.msk.msra.mxu1 %vm223_vm0, %v217_v5 }
  0x14   : > { %327 = vmatpush.msra.mxu2 %v219_v23  ;;  %353 = vmatpush.msra.mxu3 %v221_v25 }
  0x16   : > { %454 = vmatmul.msk.f32.vlgmr.msra.gmra.mxu0 %vm223_vm0, %v213_v6  ;;  %457 = vmatmul.msk.f32.vlgmr.msra.gmra.mxu1 %vm223_vm0, %v214_v7 }
  0x93   : > { %v250_v8 = vpop.f32.mrf.mxu0  ;;  %v279_v10 = vpop.f32.mrf.mxu1 }
  0x94   : > { %v283_v9 = vsel %vm282_vm1, %v250_v8, -inf  ;;  %v286_v11 = vsel %vm282_vm1, %v279_v10, -inf }
  0x95   : > { %284 = vmax.xlane.f32.xlu0 %v283_v9 }
  0x9d   : > { %287 = vmax.xlane.f32.xlu0 %v286_v11 }
 0x108   : > { %v285_v12 = vpop.xlane.xlu0 %284 }
 0x109   : > { %v289_v13 = vsub.f32 %v250_v8, %v285_v12 }
 0x10b   : > { %v291_v14 = vmul.f32 1.442695, %v289_v13 }
 0x10d   : > { %476 = vpow2.f32 %v291_v14 }
 0x110   : > { %v288_v15 = vpop.xlane.xlu0 %287 }
 0x111   : > { %v290_v16 = vsub.f32 %v279_v10, %v288_v15 }
 0x113   : > { %v477_v17 = vpop.eup %476  ;;  %v293_v18 = vmul.f32 1.442695, %v290_v16 }
 0x114   : > { %v295_v19 = vsel %vm282_vm1, %v477_v17, 0.0 }
 0x115   : > { %478 = vpow2.f32 %v293_v18  ;;  %296 = vadd.xlane.f32.xlu1 %v295_v19 }
 0x11b   : > { %v479_v20 = vpop.eup %478 }
 0x11c   : > { %v298_v21 = vsel %vm282_vm1, %v479_v20, 0.0 }
 0x11d   : > { %299 = vadd.xlane.f32.xlu1 %v298_v21 }
 0x188   : > { %v297_v26 = vpop.xlane.xlu1 %296 }
 0x189   : > { %480 = vrcp.f32 %v297_v26 }
 0x18f   : > { %v481_v27 = vpop.eup %480 }
 0x190   : > { %v300_v28 = vpop.xlane.xlu1 %299  ;;  %v303_v29 = vmul.f32 %v481_v27, %v477_v17 }
 0x191   : > { %482 = vrcp.f32 %v300_v28 }
 0x192   : > { %459 = vmatmul.msk.f32.vlgmr.msra.gmra.mxu2 %vm282_vm1, %v303_v29 }
 0x197   : > { %v483_v30 = vpop.eup %482 }
 0x198   : > { %v304_v31 = vmul.f32 %v483_v30, %v479_v20 }
 0x19a   : > { %461 = vmatmul.msk.f32.vlgmr.msra.gmra.mxu3 %vm282_vm1, %v304_v31 }
 0x215   : > { %v329_v32 = vpop.f32.mrf.mxu2 }
 0x216   : > { %358 = vst.msk [vmem:[%s210_s27] sm:$0xff] %vm223_vm0, %v329_v32 }
 0x21d   : > { %v355_v33 = vpop.f32.mrf.mxu3 }
 0x21e   : > { %359 = vst.msk [vmem:[%s210_s27 + $0x8] sm:$0xff] %vm223_vm0, %v355_v33 }
 0x21f PF: > { %s13_s12 = sadd.s32 1, %s490_s12  }
 0x220   : > { %p10_p4 = scmp.ge.s32.totalorder %s13_s12, 4  }
 0x222   :  { %12 = sbr.rel (!%p10_p4) target bundleno = 1 (0x1), region = 68 }

// kernel: basic_transformer_block.15
= control target key start
LH: loop header
LB: loop body
LE: loop exit
PB: predicated region body
PF: predicated region fallthrough
CT: control target
= control target key end

     0   :  { %vm37_vm0 = vcmask 261120   ;;  %s615_s0 = inlined_call_operand.vmem [shape: f32[16,32], index: 0, kind: input, shape index: {}]   ;;  %s616_s1 = inlined_call_operand.vmem [shape: f32[1,32], index: 1, kind: input, shape index: {}]   ;;  %s617_s2 = inlined_call_operand.vmem [shape: f32[1,32], index: 2, kind: input, shape index: {}]   ;;  %s618_s3 = inlined_call_operand.vmem [shape: f32[32,128], index: 3, kind: input, shape index: {}]   ;;  %s619_s4 = inlined_call_operand.vmem [shape: f32[1,128], index: 4, kind: input, shape index: {}]   ;;  %s620_s5 = inlined_call_operand.vmem [shape: f32[32,128], index: 5, kind: input, shape index: {}]   ;;  %s621_s6 = inlined_call_operand.vmem [shape: f32[1,128], index: 6, kind: input, shape index: {}]   ;;  %s622_s7 = inlined_call_operand.vmem [shape: f32[128,32], index: 7, kind: input, shape index: {}]   ;;  %s623_s8 = inlined_call_operand.vmem [shape: f32[1,32], index: 8, kind: input, shape index: {}]   ;;  %s624_s9 = inlined_call_operand.hbm [shape: f32[16,32], index: 9, kind: output, shape index: {}]  }
   0x1   :  { %v468_v0 = vld [vmem:[%s615_s0] sm:$0xff] }
   0x2   :  { %v45_v1 = vsel %vm37_vm0, %v468_v0, 0.0 }
   0x3   :  { %46 = vadd.xlane.f32.xlu0 %v45_v1 }
   0x4   :  { %14 = vsyncpa [#allocation4], 0  ;;  %v475_v2 = vld [vmem:[%s615_s0 + $0x8] sm:$0xff]  ;;  %v410_v4 = vmov 32.0   ;;  %v109_v21 = vld [vmem:[%s618_s3 + $0x18] sm:$0xff]  ;;  %s412_s15 = smov [#allocation3]  }
   0x5   :  { %v48_v3 = vsel %vm37_vm0, %v475_v2, 0.0  ;;  %374 = vrcp.f32 %v410_v4  ;;  %v146_v22 = vld [vmem:[%s620_s5 + $0x18] sm:$0xff]  ;;  %132 = vmatpush.msra.mxu0 %v109_v21  ;;  %v108_v23 = vld [vmem:[%s618_s3 + $0x10] sm:$0xff]  ;;  %v107_v25 = vld [vmem:[%s618_s3 + $0x8] sm:$0xff]  ;;  %s328_s16 = sshll.u32 %s412_s15, 4  ;;  %s330_s19 = sshll.u32 %s624_s9, 4  ;;  %s329_s16 = int_to_ptr.vmem [resolvable:$true] %s328_s16  ;;  %s331_s19 = int_to_ptr.hbm [resolvable:$true] %s330_s19 }
   0x6   :  { %163 = vmatpush.msra.mxu1 %v146_v22  ;;  %v145_v24 = vld [vmem:[%s620_s5 + $0x10] sm:$0xff]  ;;  %v144_v26 = vld [vmem:[%s620_s5 + $0x8] sm:$0xff]  ;;  %v106_v27 = vld [vmem:[%s618_s3] sm:$0xff] }
   0x7   :  { %133 = vmatpush.msra.mxu0 %v108_v23  ;;  %v143_v28 = vld [vmem:[%s620_s5] sm:$0xff]  ;;  %v281_v57 = vld [vmem:[%s622_s7 + $0x78] sm:$0xff]  ;;  %v280_v58 = vld [vmem:[%s622_s7 + $0x70] sm:$0xff] }
   0x8   :  { %164 = vmatpush.msra.mxu1 %v145_v24  ;;  %v369_v43 = vld [vmem:[%s616_s1] ss:$0 sm:$0xff]  ;;  %282 = vmatpush.msra.mxu2 %v281_v57  ;;  %v279_v59 = vld [vmem:[%s622_s7 + $0x68] sm:$0xff]  ;;  %v277_v63 = vld [vmem:[%s622_s7 + $0x58] sm:$0xff] }
   0x9   :  { %134 = vmatpush.msra.mxu0 %v107_v25  ;;  %v370_v47 = vld [vmem:[%s617_s2] ss:$0 sm:$0xff]  ;;  %348 = vmatpush.msra.mxu3 %v281_v57  ;;  %v269_v22 = vld [vmem:[%s622_s7 + $0x18] sm:$0xff]  ;;  %v268_v25 = vld [vmem:[%s622_s7 + $0x10] sm:$0xff] }
   0xa   :  { %165 = vmatpush.msra.mxu1 %v144_v26  ;;  %283 = vmatpush.msra.mxu2 %v280_v58  ;;  %v372_v60 = vld [vmem:[%s621_s6] ss:$0 sm:$0xff]  ;;  %s414_s6 = smov 8  }
   0xb   :  { %49 = vadd.xlane.f32.xlu0 %v48_v3  ;;  %v375_v5 = vpop.eup %374  ;;  %135 = vmatpush.msra.mxu0 %v106_v27  ;;  %v278_v61 = vld [vmem:[%s622_s7 + $0x60] sm:$0xff]  ;;  %v276_v3 = vld [vmem:[%s622_s7 + $0x50] sm:$0xff] }
   0xc   :  { %v52_v6 = vmul.f32 32.0, %v375_v5  ;;  %vm56_vm1 = vweird.f32 %v375_v5  ;;  %166 = vmatpush.msra.mxu1 %v143_v28  ;;  %349 = vmatpush.msra.mxu3 %v280_v58 }
   0xd   :  { %284 = vmatpush.msra.mxu2 %v279_v59 }
   0xe   :  { %v53_v7 = vsub.f32 1.0, %v52_v6  ;;  %350 = vmatpush.msra.mxu3 %v279_v59 }
   0xf   :  { %285 = vmatpush.msra.mxu2 %v278_v61 }
  0x10   :  { %v54_v8 = vmul.f32 %v375_v5, %v53_v7  ;;  %351 = vmatpush.msra.mxu3 %v278_v61  ;;  %v274_v7 = vld [vmem:[%s622_s7 + $0x40] sm:$0xff] }
  0x11   :  { %286 = vmatpush.msra.mxu2 %v277_v63 }
  0x12   :  { %v55_v9 = vadd.f32 %v375_v5, %v54_v8  ;;  %352 = vmatpush.msra.mxu3 %v277_v63  ;;  %v273_v8 = vld [vmem:[%s622_s7 + $0x38] sm:$0xff] }
  0x13   :  { %287 = vmatpush.msra.mxu2 %v276_v3 }
  0x14   :  { %v57_v10 = vsel %vm56_vm1, %v375_v5, %v55_v9  ;;  %353 = vmatpush.msra.mxu3 %v276_v3  ;;  %v275_v5 = vld [vmem:[%s622_s7 + $0x48] sm:$0xff] }
  0x15   :  { %288 = vmatpush.msra.mxu2 %v275_v5 }
  0x16   :  { %354 = vmatpush.msra.mxu3 %v275_v5 }
  0x17   :  { %289 = vmatpush.msra.mxu2 %v274_v7 }
  0x18   :  { %355 = vmatpush.msra.mxu3 %v274_v7 }
  0x19   :  { %290 = vmatpush.msra.mxu2 %v273_v8 }
  0x1a   :  { %356 = vmatpush.msra.mxu3 %v273_v8 }
  0x76   :  { %v47_v11 = vpop.xlane.xlu0 %46 }
  0x77   :  { %v58_v12 = vmul.f32 %v57_v10, %v47_v11  ;;  %v272_v11 = vld [vmem:[%s622_s7 + $0x30] sm:$0xff] }
  0x78   :  { %291 = vmatpush.msra.mxu2 %v272_v11  ;;  %357 = vmatpush.msra.mxu3 %v272_v11 }
  0x79   :  { %v60_v13 = vsub.f32 %v468_v0, %v58_v12 }
  0x7b   :  { %v62_v14 = vmul.f32 %v60_v13, %v60_v13 }
  0x7d   :  { %v64_v15 = vsel %vm37_vm0, %v62_v14, 0.0 }
  0x7e   :  { %65 = vadd.xlane.f32.xlu1 %v64_v15  ;;  %v50_v16 = vpop.xlane.xlu0 %49  ;;  %v271_v15 = vld [vmem:[%s622_s7 + $0x28] sm:$0xff] }
  0x7f   :  { %v59_v17 = vmul.f32 %v57_v10, %v50_v16  ;;  %292 = vmatpush.msra.mxu2 %v271_v15  ;;  %358 = vmatpush.msra.mxu3 %v271_v15 }
  0x81   :  { %v61_v18 = vsub.f32 %v475_v2, %v59_v17 }
  0x83   :  { %v63_v19 = vmul.f32 %v61_v18, %v61_v18 }
  0x85   :  { %v67_v20 = vsel %vm37_vm0, %v63_v19, 0.0 }
  0x86   :  { %68 = vadd.xlane.f32.xlu1 %v67_v20 }
  0xf1   :  { %v66_v29 = vpop.xlane.xlu1 %65 }
  0xf2   :  { %v70_v30 = vmul.f32 %v66_v29, %v57_v10 }
  0xf4   :  { %v72_v31 = vadd.f32 1e-05, %v70_v30  ;;  %v267_v30 = vld [vmem:[%s622_s7 + $0x8] sm:$0xff] }
  0xf6   :  { %376 = vrsqrt.f32 %v72_v31  ;;  %vm80_vm3 = vweird.f32 %v72_v31 }
  0xf9   :  { %v69_v32 = vpop.xlane.xlu1 %68 }
  0xfa   :  { %v71_v33 = vmul.f32 %v69_v32, %v57_v10 }
  0xfc   :  { %v377_v34 = vpop.eup %376  ;;  %v73_v35 = vadd.f32 1e-05, %v71_v33 }
  0xfd   :  { %v75_v36 = vmul.f32 %v377_v34, %v72_v31  ;;  %vm81_vm2 = vweird.f32 %v377_v34 }
  0xfe   :  { %378 = vrsqrt.f32 %v73_v35  ;;  %vm82_vm4 = vmor %vm80_vm3, %vm81_vm2  ;;  %vm90_vm6 = vweird.f32 %v73_v35 }
  0xff   :  { %v76_v37 = vmul.f32 %v377_v34, %v75_v36 }
 0x101   :  { %v77_v38 = vmul.f32 0.5, %v76_v37 }
 0x103   :  { %v78_v39 = vsub.f32 1.5, %v77_v38 }
 0x104   :  { %v379_v40 = vpop.eup %378 }
 0x105   :  { %v79_v41 = vmul.f32 %v377_v34, %v78_v39  ;;  %v85_v42 = vmul.f32 %v379_v40, %v73_v35  ;;  %vm91_vm5 = vweird.f32 %v379_v40 }
 0x106   :  { %vm92_vm7 = vmor %vm90_vm6, %vm91_vm5 }
 0x107   :  { %v83_v44 = vsel %vm82_vm4, %v377_v34, %v79_v41  ;;  %v86_v45 = vmul.f32 %v379_v40, %v85_v42  ;;  %v266_v34 = vld [vmem:[%s622_s7] sm:$0xff] }
 0x108   :  { %v94_v46 = vmul.f32 %v83_v44, %v60_v13 }
 0x109   :  { %v87_v48 = vmul.f32 0.5, %v86_v45 }
 0x10a   :  { %v99_v49 = vmul.f32 %v369_v43, %v94_v46 }
 0x10b   :  { %v88_v50 = vsub.f32 1.5, %v87_v48 }
 0x10c   :  { %v104_v51 = vadd.f32 %v370_v47, %v99_v49 }
 0x10d   :  { %v89_v52 = vmul.f32 %v379_v40, %v88_v50 }
 0x10e   :  { %342 = vmatmul.msk.f32.vlgmr.msra.gmra.mxu0 %vm37_vm0, %v104_v51  ;;  %344 = vmatmul.msk.f32.vlgmr.msra.gmra.mxu1 %vm37_vm0, %v104_v51 }
 0x10f   :  { %v93_v53 = vsel %vm92_vm7, %v379_v40, %v89_v52 }
 0x110   :  { %v95_v54 = vmul.f32 %v93_v53, %v61_v18  ;;  %v270_v18 = vld [vmem:[%s622_s7 + $0x20] sm:$0xff] }
 0x111   :  { %293 = vmatpush.msra.mxu2 %v270_v18  ;;  %359 = vmatpush.msra.mxu3 %v270_v18 }
 0x112   :  { %v100_v55 = vmul.f32 %v369_v43, %v95_v54 }
 0x113   :  { %294 = vmatpush.msra.mxu2 %v269_v22  ;;  %360 = vmatpush.msra.mxu3 %v269_v22 }
 0x114   :  { %v105_v56 = vadd.f32 %v370_v47, %v100_v55  ;;  %v411_v55 = vmov 0.0  }
 0x115   :  { %295 = vmatpush.msra.mxu2 %v268_v25  ;;  %361 = vmatpush.msra.mxu3 %v268_v25  ;;  %38 = vst.msk [vmem:[#allocation2] sm:$0xff] %vm37_vm0, %v411_v55 }
 0x116   :  { %343 = vmatmul.msk.f32.gmra.mxu0 %vm37_vm0, %v105_v56  ;;  %345 = vmatmul.msk.f32.gmra.mxu1 %vm37_vm0, %v105_v56  ;;  %39 = vst.msk [vmem:[#allocation2 + $0x8] sm:$0xff] %vm37_vm0, %v411_v55 }
 0x117   :  { %296 = vmatpush.msra.mxu2 %v267_v30  ;;  %362 = vmatpush.msra.mxu3 %v267_v30 }
 0x119   :  { %297 = vmatpush.msra.mxu2 %v266_v34  ;;  %363 = vmatpush.msra.mxu3 %v266_v34 }
 0x18b   :  { %v168_v62 = vpop.f32.mrf.mxu1  ;;  %v137_v18 = vpop.f32.mrf.mxu0 }
 0x18c   :  { %v535_v1 = vadd.f32 %v372_v60, %v168_v62 }
 0x18e   :  { %v541_v4 = vmul.f32 0.70710677, %v535_v1 }
 0x190   :  { %v178_v6 = vmul.f32 %v541_v4, %v541_v4 }
 0x192   :  { %v554_v9 = vmin.f32 %v178_v6, 16.0 }
 0x193   :  { %v171_v10 = vpop.f32.mrf.mxu1 }
 0x194   :  { %v180_v12 = vmul.f32 2.1237322e-06, %v554_v9  ;;  %v560_v13 = vadd.f32 %v372_v60, %v171_v10  ;;  %v191_v14 = vmul.f32 3.8918573e-05, %v554_v9 }
 0x196   :  { %v181_v16 = vadd.f32 0.00028619796, %v180_v12  ;;  %v567_v17 = vmul.f32 0.70710677, %v560_v13  ;;  %v192_v19 = vadd.f32 0.001143296, %v191_v14 }
 0x198   :  { %v182_v20 = vmul.f32 %v181_v16, %v554_v9  ;;  %v218_v21 = vmul.f32 %v567_v17, %v567_v17  ;;  %v193_v23 = vmul.f32 %v192_v19, %v554_v9 }
 0x19a   :  { %v219_v24 = vmin.f32 %v218_v21, 16.0  ;;  %v194_v26 = vadd.f32 0.014752088, %v193_v23  ;;  %v183_v27 = vadd.f32 0.0036580483, %v182_v20 }
 0x19c   :  { %v220_v28 = vmul.f32 2.1237322e-06, %v219_v24  ;;  %v231_v29 = vmul.f32 3.8918573e-05, %v219_v24  ;;  %v195_v31 = vmul.f32 %v194_v26, %v554_v9  ;;  %v184_v36 = vmul.f32 %v183_v27, %v554_v9 }
 0x19e   :  { %v221_v32 = vadd.f32 0.00028619796, %v220_v28  ;;  %v232_v33 = vadd.f32 0.001143296, %v231_v29  ;;  %v196_v35 = vadd.f32 0.112945676, %v195_v31 }
 0x19f   :  { %v185_v43 = vadd.f32 0.05243302, %v184_v36 }
 0x1a0   :  { %v222_v37 = vmul.f32 %v221_v32, %v219_v24  ;;  %v233_v38 = vmul.f32 %v232_v33, %v219_v24  ;;  %v197_v39 = vmul.f32 %v196_v35, %v554_v9 }
 0x1a1   :  { %v186_v49 = vmul.f32 %v185_v43, %v554_v9 }
 0x1a2   :  { %v234_v40 = vadd.f32 0.014752088, %v233_v38  ;;  %v223_v41 = vadd.f32 0.0036580483, %v222_v37  ;;  %v198_v42 = vadd.f32 0.4994258, %v197_v39  ;;  %v140_v37 = vpop.f32.mrf.mxu0 }
 0x1a3   :  { %v187_v53 = vadd.f32 0.18741608, %v186_v49  ;;  %v175_v38 = vmul.f32 0.5, %v560_v13 }
 0x1a4   :  { %v235_v44 = vmul.f32 %v234_v40, %v219_v24  ;;  %v199_v45 = vmul.f32 %v198_v42, %v554_v9  ;;  %v224_v47 = vmul.f32 %v223_v41, %v219_v24  ;;  %v264_v42 = vld [vmem:[#allocation2] sm:$0xff] }
 0x1a5   :  { %v188_v59 = vmul.f32 %v187_v53, %v554_v9 }
 0x1a6   :  { %v236_v46 = vadd.f32 0.112945676, %v235_v44  ;;  %v200_v48 = vadd.f32 1.0, %v199_v45  ;;  %v225_v52 = vadd.f32 0.05243302, %v224_v47  ;;  %v265_v44 = vld [vmem:[#allocation2 + $0x8] sm:$0xff] }
 0x1a7   :  { %v189_v3 = vadd.f32 1.1283791, %v188_v59 }
 0x1a8   :  { %v237_v50 = vmul.f32 %v236_v46, %v219_v24  ;;  %380 = vrcp.f32 %v200_v48  ;;  %v226_v58 = vmul.f32 %v225_v52, %v219_v24  ;;  %v212_v63 = vand.u32 2147483648, %v200_v48  ;;  %v373_v46 = vld [vmem:[%s623_s8] ss:$0 sm:$0xff]  ;;  %s413_s8 = smov 128  }
 0x1a9   :  { %v210_v6 = vand.u32 2147483647, %v200_v48  ;;  %vm206_vm9 = vweird.f32 %v200_v48  ;;  %v190_v14 = vmul.f32 %v189_v3, %v541_v4  ;;  %v174_v4 = vmul.f32 0.5, %v535_v1 }
 0x1aa   :  { %v238_v51 = vadd.f32 0.4994258, %v237_v50  ;;  %v227_v62 = vadd.f32 0.18741608, %v226_v58  ;;  %v213_v11 = vor.u32 1.1754944e-38, %v212_v63 }
 0x1ab   :  { %vm211_vm11 = vcmp.eq.f32.partialorder %v210_v6, 8.507059e+37 }
 0x1ac   :  { %v239_v54 = vmul.f32 %v238_v51, %v219_v24  ;;  %v228_v10 = vmul.f32 %v227_v62, %v219_v24  ;;  %v371_v24 = vld [vmem:[%s619_s4] ss:$0 sm:$0xff] }
 0x1ad   :  { %v138_v31 = vadd.f32 %v371_v24, %v137_v18  ;;  %v141_v40 = vadd.f32 %v371_v24, %v140_v37 }
 0x1ae   :  { %v240_v56 = vadd.f32 1.0, %v239_v54  ;;  %v381_v57 = vpop.eup %380  ;;  %v229_v21 = vadd.f32 1.1283791, %v228_v10 }
 0x1af   :  { %v202_v60 = vmul.f32 %v381_v57, %v200_v48  ;;  %vm207_vm8 = vweird.f32 %v381_v57 }
 0x1b0   :  { %382 = vrcp.f32 %v240_v56  ;;  %vm208_vm10 = vmor %vm206_vm9, %vm207_vm8  ;;  %v252_v20 = vand.u32 2147483648, %v240_v56  ;;  %v250_v23 = vand.u32 2147483647, %v240_v56  ;;  %vm246_vm13 = vweird.f32 %v240_v56 }
 0x1b1   :  { %v203_v61 = vsub.f32 1.0, %v202_v60  ;;  %v230_v29 = vmul.f32 %v229_v21, %v567_v17 }
 0x1b2   :  { %v253_v28 = vor.u32 1.1754944e-38, %v252_v20  ;;  %vm251_vm15 = vcmp.eq.f32.partialorder %v250_v23, 8.507059e+37 }
 0x1b3   :  { %v204_v5 = vmul.f32 %v381_v57, %v203_v61 }
 0x1b5   :  { %v205_v8 = vadd.f32 %v381_v57, %v204_v5 }
 0x1b6   :  { %v383_v7 = vpop.eup %382 }
 0x1b7   :  { %v242_v12 = vmul.f32 %v383_v7, %v240_v56  ;;  %v209_v15 = vsel %vm208_vm10, %v381_v57, %v205_v8  ;;  %vm247_vm12 = vweird.f32 %v383_v7 }
 0x1b8   :  { %v214_v9 = vsel %vm211_vm11, %v213_v11, %v209_v15  ;;  %vm248_vm14 = vmor %vm246_vm13, %vm247_vm12 }
 0x1b9   :  { %v243_v16 = vsub.f32 1.0, %v242_v12  ;;  %v215_v19 = vmul.f32 %v214_v9, %v190_v14 }
 0x1bb   :  { %v244_v22 = vmul.f32 %v383_v7, %v243_v16  ;;  %v346_v25 = vclamps-f32 %v215_v19, 1.0 }
 0x1bd   :  { %v245_v26 = vadd.f32 %v383_v7, %v244_v22  ;;  %v258_v27 = vadd.f32 1.0, %v346_v25 }
 0x1bf   :  { %v249_v30 = vsel %vm248_vm14, %v383_v7, %v245_v26  ;;  %v260_v32 = vmul.f32 %v258_v27, %v174_v4 }
 0x1c0   :  { %v254_v33 = vsel %vm251_vm15, %v253_v28, %v249_v30 }
 0x1c1   :  { %v255_v34 = vmul.f32 %v254_v33, %v230_v29  ;;  %v262_v35 = vmul.f32 %v260_v32, %v138_v31 }
 0x1c3   :  { %v347_v36 = vclamps-f32 %v255_v34, 1.0  ;;  %298 = vmatmul.f32.vlgmr.msra.gmra.mxu2 %v262_v35 }
 0x1c5   :  { %v259_v39 = vadd.f32 1.0, %v347_v36 }
 0x1c7   :  { %v261_v1 = vmul.f32 %v259_v39, %v175_v38 }
 0x1c9   :  { %v263_v41 = vmul.f32 %v261_v1, %v141_v40 }
 0x1cb   :  { %301 = vmatmul.f32.vlgmr.msra.gmra.mxu3 %v263_v41 }
 0x246   :  { %v299_v43 = vpop.f32.mrf.mxu2 }
 0x247   :  { %v305_v17 = vadd.f32 %v299_v43, %v264_v42 }
 0x249   :  { %307 = vst.msk [vmem:[#allocation2] sm:$0xff] %vm37_vm0, %v305_v17 }
 0x24e   :  { %v302_v45 = vpop.f32.mrf.mxu3 }
 0x24f   :  { %v306_v47 = vadd.f32 %v302_v45, %v265_v44 }
 0x250   :  { %v312_v13 = vld [vmem:[#allocation2] sm:$0xff] }
 0x251   :  { %308 = vst.msk [vmem:[#allocation2 + $0x8] sm:$0xff] %vm37_vm0, %v306_v47  ;;  %v318_v48 = vadd.f32 %v373_v46, %v312_v13 }
 0x253   :  { %v320_v49 = vadd.f32 %v318_v48, %v468_v0 }
 0x255   :  { %322 = vst.msk [vmem:[#allocation3] sm:$0xff] %vm37_vm0, %v320_v49 }
 0x258   :  { %v313_v50 = vld [vmem:[#allocation2 + $0x8] sm:$0xff] }
 0x259   :  { %v319_v51 = vadd.f32 %v373_v46, %v313_v50 }
 0x25b   :  { %v321_v52 = vadd.f32 %v319_v51, %v475_v2 }
 0x25d   :  { %323 = vst.msk [vmem:[#allocation3 + $0x8] sm:$0xff] %vm37_vm0, %v321_v52 }
 0x25e   :  { %336 = dma.vmem_to_hbm [thread:$0]  %s329_s16, 256, %s331_s19, [#allocation4], %s413_s8, %s413_s8, %s414_s6  }
 0x25f   :  { %408 = dma.done.wait [#allocation4], 256  }
 0x260   :  { %409 = vsyncadd [#allocation4], 4294967040 }
 0x261   :  { %341 = vsyncpa [#allocation4], 1 }

</bundles_post_ra>
